<compile_context>
chip_gen: v7x
topology: tpu7x:2x2x1
jax: 0.10.0
libtpu: 0.0.40
codegen_flags: <defaults>
</compile_context>

<pallas_src>
import functools

import numpy as np
import jax
import jax.numpy as jnp
from jax import lax
from jax.experimental import pallas as pl
from jax.experimental.pallas import tpu as pltpu


# ----------------------------------------------------------------------------
# Host-side constants (nearest-neighbor selectors, conv-weight repacking)
# ----------------------------------------------------------------------------
def _nearest_src_index(out_size, in_size):
    # PyTorch F.interpolate(mode='nearest'): src = floor(dst * in/out)
    src = np.floor(np.arange(out_size) * (in_size / out_size)).astype(np.int64)
    return np.clip(src, 0, in_size - 1)


def _width_pad_selector(w, W):
    """(w, W+2) selector: column j+1 takes source column floor(j*w/W);
    columns 0 and W+1 stay zero, so the horizontal conv padding is built in."""
    sel = np.zeros((w, W + 2), np.float32)
    sel[_nearest_src_index(W, w), np.arange(W) + 1] = 1.0
    return sel


# ----------------------------------------------------------------------------
# Pallas kernel: one batch image per grid step
# ----------------------------------------------------------------------------
def _upconv_kernel(x_ref, rw_ref, w_ref, o_ref, t1_ref, flat_ref,
                   *, C, h, H, W, F, slope, src_h):
    Wp, Hp = W + 2, H + 2
    acc_len = H * Wp            # extended output length (2 wrap cols per row)

    # ---- halo: zero ONLY the top / bottom padded rows (the left/right pad
    # columns come from the zero columns of rw_ref).  Re-zeroed every step:
    # it is 2 rows, and it keeps per-core scratch correct under megacore.
    flat_ref[:, pl.ds(0, Wp)] = jnp.zeros((C, Wp), flat_ref.dtype)
    flat_ref[:, pl.ds((Hp - 1) * Wp, Wp + 2)] = jnp.zeros((C, Wp + 2),
                                                          flat_ref.dtype)

    # ---- width pass: one matmul for ALL channels: (C*h, w) @ (w, Wp) --------
    t1 = jnp.dot(x_ref[0], rw_ref[...], preferred_element_type=jnp.float32)
    t1_ref[...] = t1.reshape(C, h, Wp)       # leading-dim split, Wp stays minor

    # ---- height pass: replicate source rows into padded rows 1..H of the ----
    # flat (C, Hp*Wp) image; cast to bf16 for the conv GEMM operands.
    for i in range(H):
        row = t1_ref[:, src_h[i], :]                              # (C, Wp)
        flat_ref[:, pl.ds((i + 1) * Wp, Wp)] = row.astype(flat_ref.dtype)

    # ---- 3x3 conv: 9 accumulating GEMMs over shifted flat views -------------
    # Output pixel (i, j) lives at extended column i*Wp + j; tap (di, dj) reads
    # the flat image shifted by di*Wp + dj.  Columns j in [W, Wp) are wrap
    # garbage and are dropped below.
    acc = jnp.zeros((F, acc_len), jnp.float32)
    for di in range(3):
        for dj in range(3):
            tap = di * 3 + dj
            off = di * Wp + dj
            acc = acc + jnp.dot(w_ref[tap],
                                flat_ref[:, pl.ds(off, acc_len)],
                                preferred_element_type=jnp.float32)

    # ---- LeakyReLU(0.1) in f32 ----------------------------------------------
    y = jnp.where(acc > 0, acc, slope * acc)

    # ---- compact away the 2 wrap columns per row -> ONE lane-dense ----------
    # (F, H*W) output block; the writeback DMA minor dim is a 128 multiple.
    for i in range(H):
        o_ref[0, :, pl.ds(i * W, W)] = y[:, i * Wp:i * Wp + W].astype(o_ref.dtype)


# ----------------------------------------------------------------------------
# Wrapper
# ----------------------------------------------------------------------------
def upconv2d_forward(x, weight, shape, *, slope=0.1, conv_dtype=jnp.bfloat16):
    """UpConv2d.forward: N x C x h x w -> N x F x H x W (NCHW in/out)."""
    N, C, h, w = x.shape
    F, C_k, kh, kw = weight.shape
    H, W = shape
    assert C_k == C and (kh, kw) == (3, 3)
    Wp, Hp = W + 2, H + 2

    x2 = x.reshape(N, C * h, w)                         # free metadata reshape
    rw = jnp.asarray(_width_pad_selector(w, W))         # (w, Wp) f32
    # (F, C, 3, 3) -> (9, F, C) with tap order t = di*3 + dj; bf16 operands.
    w9 = jnp.transpose(weight, (2, 3, 0, 1)).reshape(9, F, C).astype(conv_dtype)
    src_h = tuple(int(v) for v in _nearest_src_index(H, h))

    kern = functools.partial(_upconv_kernel, C=C, h=h, H=H, W=W, F=F,
                             slope=slope, src_h=src_h)
    out = pl.pallas_call(
        kern,
        out_shape=jax.ShapeDtypeStruct((N, F, H * W), jnp.float32),
        grid=(N,),
        in_specs=[
            pl.BlockSpec((1, C * h, w), lambda n: (n, 0, 0)),
            pl.BlockSpec((w, Wp), lambda n: (0, 0)),
            pl.BlockSpec((9, F, C), lambda n: (0, 0, 0)),
        ],
        out_specs=pl.BlockSpec((1, F, H * W), lambda n: (n, 0, 0)),
        scratch_shapes=[
            pltpu.VMEM((C, h, Wp), jnp.float32),        # width-padded rows
            pltpu.VMEM((C, Hp * Wp + 2), conv_dtype),   # flat padded image
        ],
        compiler_params=pltpu.CompilerParams(
            dimension_semantics=("parallel",)),
    )(x2, rw, w9)
    return out.reshape(N, F, H, W)                      # free metadata reshape


# ----------------------------------------------------------------------------
# Pure-JAX reference (for correctness check)
# ----------------------------------------------------------------------------
def _ref_forward(x, weight, shape, *, slope=0.1):
    N, C, h, w = x.shape
    F = weight.shape[0]
    H, W = shape
    sh = jnp.asarray(_nearest_src_index(H, h))
    sw = jnp.asarray(_nearest_src_index(W, w))
    up = x[:, :, sh, :][:, :, :, sw]                               # (N,C,H,W)
    upp = jnp.pad(up, ((0, 0), (0, 0), (1, 1), (1, 1)))
    out = jnp.zeros((N, F, H, W), jnp.float32)
    for di in range(3):
        for dj in range(3):
            out = out + jnp.einsum(
                'fc,nchw->nfhw', weight[:, :, di, dj],
                upp[:, :, di:di + H, dj:dj + W],
                precision=lax.Precision.HIGHEST)
    return jnp.where(out > 0, out, slope * out)


# ----------------------------------------------------------------------------
# Main
# ----------------------------------------------------------------------------
if __name__ == "__main__":
    N, C, h, w = 2, 4, 8, 8          # input  N x C x h x w
    out_channels = 4
    shape = (16, 16)                 # target (H, W) passed to forward()

    key = jax.random.PRNGKey(0)
    k_x, k_w = jax.random.split(key)
    x = jax.random.normal(k_x, (N, C, h, w), jnp.float32)
    # PyTorch Conv2d default init (kaiming_uniform, a=sqrt(5)): U(+-1/sqrt(fan_in))
    bound = 1.0 / np.sqrt(C * 3 * 3)
    weight = jax.random.uniform(k_w, (out_channels, C, 3, 3), jnp.float32,
                                -bound, bound)

    out = upconv2d_forward(x, weight, shape)
    out = jax.block_until_ready(out)
    assert out.shape == (N, out_channels, shape[0], shape[1])
    assert bool(jnp.all(jnp.isfinite(out)))

    ref = _ref_forward(x, weight, shape)
    max_err = float(jnp.max(jnp.abs(out - ref)))
    # bf16 conv-GEMM operands (f32 accumulate) per the perf review, so the
    # tolerance vs the pure-f32 reference is slightly loosened.
    assert bool(jnp.allclose(out, ref, rtol=5e-2, atol=5e-2)), max_err

    print("KERNEL_OK")
</pallas_src>

<mosaic_0001>
module attributes {stable_mosaic.version = 11 : i64} {
  func.func @_upconv_kernel(%arg0: i32, %arg1: memref<1x32x8xf32, #tpu.memory_space<vmem>>, %arg2: memref<8x18xf32, #tpu.memory_space<vmem>>, %arg3: memref<9x4x4xbf16, #tpu.memory_space<vmem>>, %arg4: memref<1x4x256xf32, #tpu.memory_space<vmem>>, %arg5: memref<4x8x18xf32, #tpu.memory_space<vmem>>, %arg6: memref<4x326xbf16, #tpu.memory_space<vmem>>) attributes {dimension_semantics = [#tpu.dimension_semantics<parallel>], iteration_bounds = array<i64: 2>, scalar_prefetch = 0 : i64, scratch_operands = 2 : i64, tpu.core_type = #tpu.core_type<tc>, window_params = [{transform_indices = @transform_0, window_bounds = array<i64: 1, 32, 8>}, {pipeline_mode = #tpu.pipeline_mode<synchronous>, transform_indices = @transform_1, window_bounds = array<i64: 8, 18>}, {pipeline_mode = #tpu.pipeline_mode<synchronous>, transform_indices = @transform_2, window_bounds = array<i64: 9, 4, 4>}, {transform_indices = @transform_3, window_bounds = array<i64: 1, 4, 256>}]} {
    %cst = arith.constant 0.000000e+00 : bf16
    %0 = vector.broadcast %cst : bf16 to vector<4x18xbf16>
    %c0 = arith.constant 0 : index
    %c0_0 = arith.constant 0 : index
    %1 = vector.load %arg6[%c0, %c0_0] : memref<4x326xbf16, #tpu.memory_space<vmem>>, vector<4x18xbf16>
    tpu.vector_store %arg6[%c0, %c0_0], %0 {strides = array<i32>} : memref<4x326xbf16, #tpu.memory_space<vmem>>, vector<4x18xbf16>,
    %cst_1 = arith.constant 0.000000e+00 : bf16
    %2 = vector.broadcast %cst_1 : bf16 to vector<4x20xbf16>
    %c0_2 = arith.constant 0 : index
    %c306 = arith.constant 306 : index
    %3 = vector.load %arg6[%c0_2, %c306] : memref<4x326xbf16, #tpu.memory_space<vmem>>, vector<4x20xbf16>
    tpu.vector_store %arg6[%c0_2, %c306], %2 {strides = array<i32>} : memref<4x326xbf16, #tpu.memory_space<vmem>>, vector<4x20xbf16>,
    %c0_3 = arith.constant 0 : index
    %c0_4 = arith.constant 0 : index
    %c0_5 = arith.constant 0 : index
    %4 = vector.load %arg1[%c0_3, %c0_4, %c0_5] : memref<1x32x8xf32, #tpu.memory_space<vmem>>, vector<1x32x8xf32>
    %5 = vector.shape_cast %4 : vector<1x32x8xf32> to vector<32x8xf32>
    %c0_6 = arith.constant 0 : index
    %c0_7 = arith.constant 0 : index
    %6 = vector.load %arg2[%c0_6, %c0_7] : memref<8x18xf32, #tpu.memory_space<vmem>>, vector<8x18xf32>
    %cst_8 = arith.constant dense<0.000000e+00> : vector<32x18xf32>
    %7 = tpu.matmul %5, %6, %cst_8 {dimension_numbers = #tpu.dot_dimension_numbers<[1], [0], [0], [1], [0, 0, 1, 1], [], []>} : vector<32x8xf32>, vector<8x18xf32>, vector<32x18xf32> -> vector<32x18xf32>
    %8 = vector.shape_cast %7 : vector<32x18xf32> to vector<4x8x18xf32>
    %c0_9 = arith.constant 0 : index
    %c0_10 = arith.constant 0 : index
    %c0_11 = arith.constant 0 : index
    %9 = vector.load %arg5[%c0_9, %c0_10, %c0_11] : memref<4x8x18xf32, #tpu.memory_space<vmem>>, vector<4x8x18xf32>
    tpu.vector_store %arg5[%c0_9, %c0_10, %c0_11], %8 {strides = array<i32>} : memref<4x8x18xf32, #tpu.memory_space<vmem>>, vector<4x8x18xf32>,
    %c0_12 = arith.constant 0 : index
    %c0_13 = arith.constant 0 : index
    %c0_14 = arith.constant 0 : index
    %10 = vector.load %arg5[%c0_12, %c0_13, %c0_14] : memref<4x8x18xf32, #tpu.memory_space<vmem>>, vector<4x1x18xf32>
    %11 = vector.shape_cast %10 : vector<4x1x18xf32> to vector<4x18xf32>
    %12 = arith.truncf %11 : vector<4x18xf32> to vector<4x18xbf16>
    %c0_15 = arith.constant 0 : index
    %c18 = arith.constant 18 : index
    %13 = vector.load %arg6[%c0_15, %c18] : memref<4x326xbf16, #tpu.memory_space<vmem>>, vector<4x18xbf16>
    tpu.vector_store %arg6[%c0_15, %c18], %12 {strides = array<i32>} : memref<4x326xbf16, #tpu.memory_space<vmem>>, vector<4x18xbf16>,
    %c0_16 = arith.constant 0 : index
    %c0_17 = arith.constant 0 : index
    %c0_18 = arith.constant 0 : index
    %14 = vector.load %arg5[%c0_16, %c0_17, %c0_18] : memref<4x8x18xf32, #tpu.memory_space<vmem>>, vector<4x1x18xf32>
    %15 = vector.shape_cast %14 : vector<4x1x18xf32> to vector<4x18xf32>
    %16 = arith.truncf %15 : vector<4x18xf32> to vector<4x18xbf16>
    %c0_19 = arith.constant 0 : index
    %c36 = arith.constant 36 : index
    %17 = vector.load %arg6[%c0_19, %c36] : memref<4x326xbf16, #tpu.memory_space<vmem>>, vector<4x18xbf16>
    tpu.vector_store %arg6[%c0_19, %c36], %16 {strides = array<i32>} : memref<4x326xbf16, #tpu.memory_space<vmem>>, vector<4x18xbf16>,
    %c0_20 = arith.constant 0 : index
    %c1 = arith.constant 1 : index
    %c0_21 = arith.constant 0 : index
    %18 = vector.load %arg5[%c0_20, %c1, %c0_21] : memref<4x8x18xf32, #tpu.memory_space<vmem>>, vector<4x1x18xf32>
    %19 = vector.shape_cast %18 : vector<4x1x18xf32> to vector<4x18xf32>
    %20 = arith.truncf %19 : vector<4x18xf32> to vector<4x18xbf16>
    %c0_22 = arith.constant 0 : index
    %c54 = arith.constant 54 : index
    %21 = vector.load %arg6[%c0_22, %c54] : memref<4x326xbf16, #tpu.memory_space<vmem>>, vector<4x18xbf16>
    tpu.vector_store %arg6[%c0_22, %c54], %20 {strides = array<i32>} : memref<4x326xbf16, #tpu.memory_space<vmem>>, vector<4x18xbf16>,
    %c0_23 = arith.constant 0 : index
    %c1_24 = arith.constant 1 : index
    %c0_25 = arith.constant 0 : index
    %22 = vector.load %arg5[%c0_23, %c1_24, %c0_25] : memref<4x8x18xf32, #tpu.memory_space<vmem>>, vector<4x1x18xf32>
    %23 = vector.shape_cast %22 : vector<4x1x18xf32> to vector<4x18xf32>
    %24 = arith.truncf %23 : vector<4x18xf32> to vector<4x18xbf16>
    %c0_26 = arith.constant 0 : index
    %c72 = arith.constant 72 : index
    %25 = vector.load %arg6[%c0_26, %c72] : memref<4x326xbf16, #tpu.memory_space<vmem>>, vector<4x18xbf16>
    tpu.vector_store %arg6[%c0_26, %c72], %24 {strides = array<i32>} : memref<4x326xbf16, #tpu.memory_space<vmem>>, vector<4x18xbf16>,
    %c0_27 = arith.constant 0 : index
    %c2 = arith.constant 2 : index
    %c0_28 = arith.constant 0 : index
    %26 = vector.load %arg5[%c0_27, %c2, %c0_28] : memref<4x8x18xf32, #tpu.memory_space<vmem>>, vector<4x1x18xf32>
    %27 = vector.shape_cast %26 : vector<4x1x18xf32> to vector<4x18xf32>
    %28 = arith.truncf %27 : vector<4x18xf32> to vector<4x18xbf16>
    %c0_29 = arith.constant 0 : index
    %c90 = arith.constant 90 : index
    %29 = vector.load %arg6[%c0_29, %c90] : memref<4x326xbf16, #tpu.memory_space<vmem>>, vector<4x18xbf16>
    tpu.vector_store %arg6[%c0_29, %c90], %28 {strides = array<i32>} : memref<4x326xbf16, #tpu.memory_space<vmem>>, vector<4x18xbf16>,
    %c0_30 = arith.constant 0 : index
    %c2_31 = arith.constant 2 : index
    %c0_32 = arith.constant 0 : index
    %30 = vector.load %arg5[%c0_30, %c2_31, %c0_32] : memref<4x8x18xf32, #tpu.memory_space<vmem>>, vector<4x1x18xf32>
    %31 = vector.shape_cast %30 : vector<4x1x18xf32> to vector<4x18xf32>
    %32 = arith.truncf %31 : vector<4x18xf32> to vector<4x18xbf16>
    %c0_33 = arith.constant 0 : index
    %c108 = arith.constant 108 : index
    %33 = vector.load %arg6[%c0_33, %c108] : memref<4x326xbf16, #tpu.memory_space<vmem>>, vector<4x18xbf16>
    tpu.vector_store %arg6[%c0_33, %c108], %32 {strides = array<i32>} : memref<4x326xbf16, #tpu.memory_space<vmem>>, vector<4x18xbf16>,
    %c0_34 = arith.constant 0 : index
    %c3 = arith.constant 3 : index
    %c0_35 = arith.constant 0 : index
    %34 = vector.load %arg5[%c0_34, %c3, %c0_35] : memref<4x8x18xf32, #tpu.memory_space<vmem>>, vector<4x1x18xf32>
    %35 = vector.shape_cast %34 : vector<4x1x18xf32> to vector<4x18xf32>
    %36 = arith.truncf %35 : vector<4x18xf32> to vector<4x18xbf16>
    %c0_36 = arith.constant 0 : index
    %c126 = arith.constant 126 : index
    %37 = vector.load %arg6[%c0_36, %c126] : memref<4x326xbf16, #tpu.memory_space<vmem>>, vector<4x18xbf16>
    tpu.vector_store %arg6[%c0_36, %c126], %36 {strides = array<i32>} : memref<4x326xbf16, #tpu.memory_space<vmem>>, vector<4x18xbf16>,
    %c0_37 = arith.constant 0 : index
    %c3_38 = arith.constant 3 : index
    %c0_39 = arith.constant 0 : index
    %38 = vector.load %arg5[%c0_37, %c3_38, %c0_39] : memref<4x8x18xf32, #tpu.memory_space<vmem>>, vector<4x1x18xf32>
    %39 = vector.shape_cast %38 : vector<4x1x18xf32> to vector<4x18xf32>
    %40 = arith.truncf %39 : vector<4x18xf32> to vector<4x18xbf16>
    %c0_40 = arith.constant 0 : index
    %c144 = arith.constant 144 : index
    %41 = vector.load %arg6[%c0_40, %c144] : memref<4x326xbf16, #tpu.memory_space<vmem>>, vector<4x18xbf16>
    tpu.vector_store %arg6[%c0_40, %c144], %40 {strides = array<i32>} : memref<4x326xbf16, #tpu.memory_space<vmem>>, vector<4x18xbf16>,
    %c0_41 = arith.constant 0 : index
    %c4 = arith.constant 4 : index
    %c0_42 = arith.constant 0 : index
    %42 = vector.load %arg5[%c0_41, %c4, %c0_42] : memref<4x8x18xf32, #tpu.memory_space<vmem>>, vector<4x1x18xf32>
    %43 = vector.shape_cast %42 : vector<4x1x18xf32> to vector<4x18xf32>
    %44 = arith.truncf %43 : vector<4x18xf32> to vector<4x18xbf16>
    %c0_43 = arith.constant 0 : index
    %c162 = arith.constant 162 : index
    %45 = vector.load %arg6[%c0_43, %c162] : memref<4x326xbf16, #tpu.memory_space<vmem>>, vector<4x18xbf16>
    tpu.vector_store %arg6[%c0_43, %c162], %44 {strides = array<i32>} : memref<4x326xbf16, #tpu.memory_space<vmem>>, vector<4x18xbf16>,
    %c0_44 = arith.constant 0 : index
    %c4_45 = arith.constant 4 : index
    %c0_46 = arith.constant 0 : index
    %46 = vector.load %arg5[%c0_44, %c4_45, %c0_46] : memref<4x8x18xf32, #tpu.memory_space<vmem>>, vector<4x1x18xf32>
    %47 = vector.shape_cast %46 : vector<4x1x18xf32> to vector<4x18xf32>
    %48 = arith.truncf %47 : vector<4x18xf32> to vector<4x18xbf16>
    %c0_47 = arith.constant 0 : index
    %c180 = arith.constant 180 : index
    %49 = vector.load %arg6[%c0_47, %c180] : memref<4x326xbf16, #tpu.memory_space<vmem>>, vector<4x18xbf16>
    tpu.vector_store %arg6[%c0_47, %c180], %48 {strides = array<i32>} : memref<4x326xbf16, #tpu.memory_space<vmem>>, vector<4x18xbf16>,
    %c0_48 = arith.constant 0 : index
    %c5 = arith.constant 5 : index
    %c0_49 = arith.constant 0 : index
    %50 = vector.load %arg5[%c0_48, %c5, %c0_49] : memref<4x8x18xf32, #tpu.memory_space<vmem>>, vector<4x1x18xf32>
    %51 = vector.shape_cast %50 : vector<4x1x18xf32> to vector<4x18xf32>
    %52 = arith.truncf %51 : vector<4x18xf32> to vector<4x18xbf16>
    %c0_50 = arith.constant 0 : index
    %c198 = arith.constant 198 : index
    %53 = vector.load %arg6[%c0_50, %c198] : memref<4x326xbf16, #tpu.memory_space<vmem>>, vector<4x18xbf16>
    tpu.vector_store %arg6[%c0_50, %c198], %52 {strides = array<i32>} : memref<4x326xbf16, #tpu.memory_space<vmem>>, vector<4x18xbf16>,
    %c0_51 = arith.constant 0 : index
    %c5_52 = arith.constant 5 : index
    %c0_53 = arith.constant 0 : index
    %54 = vector.load %arg5[%c0_51, %c5_52, %c0_53] : memref<4x8x18xf32, #tpu.memory_space<vmem>>, vector<4x1x18xf32>
    %55 = vector.shape_cast %54 : vector<4x1x18xf32> to vector<4x18xf32>
    %56 = arith.truncf %55 : vector<4x18xf32> to vector<4x18xbf16>
    %c0_54 = arith.constant 0 : index
    %c216 = arith.constant 216 : index
    %57 = vector.load %arg6[%c0_54, %c216] : memref<4x326xbf16, #tpu.memory_space<vmem>>, vector<4x18xbf16>
    tpu.vector_store %arg6[%c0_54, %c216], %56 {strides = array<i32>} : memref<4x326xbf16, #tpu.memory_space<vmem>>, vector<4x18xbf16>,
    %c0_55 = arith.constant 0 : index
    %c6 = arith.constant 6 : index
    %c0_56 = arith.constant 0 : index
    %58 = vector.load %arg5[%c0_55, %c6, %c0_56] : memref<4x8x18xf32, #tpu.memory_space<vmem>>, vector<4x1x18xf32>
    %59 = vector.shape_cast %58 : vector<4x1x18xf32> to vector<4x18xf32>
    %60 = arith.truncf %59 : vector<4x18xf32> to vector<4x18xbf16>
    %c0_57 = arith.constant 0 : index
    %c234 = arith.constant 234 : index
    %61 = vector.load %arg6[%c0_57, %c234] : memref<4x326xbf16, #tpu.memory_space<vmem>>, vector<4x18xbf16>
    tpu.vector_store %arg6[%c0_57, %c234], %60 {strides = array<i32>} : memref<4x326xbf16, #tpu.memory_space<vmem>>, vector<4x18xbf16>,
    %c0_58 = arith.constant 0 : index
    %c6_59 = arith.constant 6 : index
    %c0_60 = arith.constant 0 : index
    %62 = vector.load %arg5[%c0_58, %c6_59, %c0_60] : memref<4x8x18xf32, #tpu.memory_space<vmem>>, vector<4x1x18xf32>
    %63 = vector.shape_cast %62 : vector<4x1x18xf32> to vector<4x18xf32>
    %64 = arith.truncf %63 : vector<4x18xf32> to vector<4x18xbf16>
    %c0_61 = arith.constant 0 : index
    %c252 = arith.constant 252 : index
    %65 = vector.load %arg6[%c0_61, %c252] : memref<4x326xbf16, #tpu.memory_space<vmem>>, vector<4x18xbf16>
    tpu.vector_store %arg6[%c0_61, %c252], %64 {strides = array<i32>} : memref<4x326xbf16, #tpu.memory_space<vmem>>, vector<4x18xbf16>,
    %c0_62 = arith.constant 0 : index
    %c7 = arith.constant 7 : index
    %c0_63 = arith.constant 0 : index
    %66 = vector.load %arg5[%c0_62, %c7, %c0_63] : memref<4x8x18xf32, #tpu.memory_space<vmem>>, vector<4x1x18xf32>
    %67 = vector.shape_cast %66 : vector<4x1x18xf32> to vector<4x18xf32>
    %68 = arith.truncf %67 : vector<4x18xf32> to vector<4x18xbf16>
    %c0_64 = arith.constant 0 : index
    %c270 = arith.constant 270 : index
    %69 = vector.load %arg6[%c0_64, %c270] : memref<4x326xbf16, #tpu.memory_space<vmem>>, vector<4x18xbf16>
    tpu.vector_store %arg6[%c0_64, %c270], %68 {strides = array<i32>} : memref<4x326xbf16, #tpu.memory_space<vmem>>, vector<4x18xbf16>,
    %c0_65 = arith.constant 0 : index
    %c7_66 = arith.constant 7 : index
    %c0_67 = arith.constant 0 : index
    %70 = vector.load %arg5[%c0_65, %c7_66, %c0_67] : memref<4x8x18xf32, #tpu.memory_space<vmem>>, vector<4x1x18xf32>
    %71 = vector.shape_cast %70 : vector<4x1x18xf32> to vector<4x18xf32>
    %72 = arith.truncf %71 : vector<4x18xf32> to vector<4x18xbf16>
    %c0_68 = arith.constant 0 : index
    %c288 = arith.constant 288 : index
    %73 = vector.load %arg6[%c0_68, %c288] : memref<4x326xbf16, #tpu.memory_space<vmem>>, vector<4x18xbf16>
    tpu.vector_store %arg6[%c0_68, %c288], %72 {strides = array<i32>} : memref<4x326xbf16, #tpu.memory_space<vmem>>, vector<4x18xbf16>,
    %cst_69 = arith.constant 0.000000e+00 : f32
    %74 = vector.broadcast %cst_69 : f32 to vector<4x288xf32>
    %c0_70 = arith.constant 0 : index
    %c0_71 = arith.constant 0 : index
    %c0_72 = arith.constant 0 : index
    %75 = vector.load %arg3[%c0_70, %c0_71, %c0_72] : memref<9x4x4xbf16, #tpu.memory_space<vmem>>, vector<1x4x4xbf16>
    %76 = vector.shape_cast %75 : vector<1x4x4xbf16> to vector<4x4xbf16>
    %c0_73 = arith.constant 0 : index
    %c0_74 = arith.constant 0 : index
    %77 = vector.load %arg6[%c0_73, %c0_74] : memref<4x326xbf16, #tpu.memory_space<vmem>>, vector<4x288xbf16>
    %cst_75 = arith.constant dense<0.000000e+00> : vector<4x288xf32>
    %78 = tpu.matmul %76, %77, %cst_75 {dimension_numbers = #tpu.dot_dimension_numbers<[1], [0], [0], [1], [0, 0, 1, 1], [], []>} : vector<4x4xbf16>, vector<4x288xbf16>, vector<4x288xf32> -> vector<4x288xf32>
    %79 = arith.addf %74, %78 : vector<4x288xf32>
    %c1_76 = arith.constant 1 : index
    %c0_77 = arith.constant 0 : index
    %c0_78 = arith.constant 0 : index
    %80 = vector.load %arg3[%c1_76, %c0_77, %c0_78] : memref<9x4x4xbf16, #tpu.memory_space<vmem>>, vector<1x4x4xbf16>
    %81 = vector.shape_cast %80 : vector<1x4x4xbf16> to vector<4x4xbf16>
    %c0_79 = arith.constant 0 : index
    %c1_80 = arith.constant 1 : index
    %82 = vector.load %arg6[%c0_79, %c1_80] : memref<4x326xbf16, #tpu.memory_space<vmem>>, vector<4x288xbf16>
    %cst_81 = arith.constant dense<0.000000e+00> : vector<4x288xf32>
    %83 = tpu.matmul %81, %82, %cst_81 {dimension_numbers = #tpu.dot_dimension_numbers<[1], [0], [0], [1], [0, 0, 1, 1], [], []>} : vector<4x4xbf16>, vector<4x288xbf16>, vector<4x288xf32> -> vector<4x288xf32>
    %84 = arith.addf %79, %83 : vector<4x288xf32>
    %c2_82 = arith.constant 2 : index
    %c0_83 = arith.constant 0 : index
    %c0_84 = arith.constant 0 : index
    %85 = vector.load %arg3[%c2_82, %c0_83, %c0_84] : memref<9x4x4xbf16, #tpu.memory_space<vmem>>, vector<1x4x4xbf16>
    %86 = vector.shape_cast %85 : vector<1x4x4xbf16> to vector<4x4xbf16>
    %c0_85 = arith.constant 0 : index
    %c2_86 = arith.constant 2 : index
    %87 = vector.load %arg6[%c0_85, %c2_86] : memref<4x326xbf16, #tpu.memory_space<vmem>>, vector<4x288xbf16>
    %cst_87 = arith.constant dense<0.000000e+00> : vector<4x288xf32>
    %88 = tpu.matmul %86, %87, %cst_87 {dimension_numbers = #tpu.dot_dimension_numbers<[1], [0], [0], [1], [0, 0, 1, 1], [], []>} : vector<4x4xbf16>, vector<4x288xbf16>, vector<4x288xf32> -> vector<4x288xf32>
    %89 = arith.addf %84, %88 : vector<4x288xf32>
    %c3_88 = arith.constant 3 : index
    %c0_89 = arith.constant 0 : index
    %c0_90 = arith.constant 0 : index
    %90 = vector.load %arg3[%c3_88, %c0_89, %c0_90] : memref<9x4x4xbf16, #tpu.memory_space<vmem>>, vector<1x4x4xbf16>
    %91 = vector.shape_cast %90 : vector<1x4x4xbf16> to vector<4x4xbf16>
    %c0_91 = arith.constant 0 : index
    %c18_92 = arith.constant 18 : index
    %92 = vector.load %arg6[%c0_91, %c18_92] : memref<4x326xbf16, #tpu.memory_space<vmem>>, vector<4x288xbf16>
    %cst_93 = arith.constant dense<0.000000e+00> : vector<4x288xf32>
    %93 = tpu.matmul %91, %92, %cst_93 {dimension_numbers = #tpu.dot_dimension_numbers<[1], [0], [0], [1], [0, 0, 1, 1], [], []>} : vector<4x4xbf16>, vector<4x288xbf16>, vector<4x288xf32> -> vector<4x288xf32>
    %94 = arith.addf %89, %93 : vector<4x288xf32>
    %c4_94 = arith.constant 4 : index
    %c0_95 = arith.constant 0 : index
    %c0_96 = arith.constant 0 : index
    %95 = vector.load %arg3[%c4_94, %c0_95, %c0_96] : memref<9x4x4xbf16, #tpu.memory_space<vmem>>, vector<1x4x4xbf16>
    %96 = vector.shape_cast %95 : vector<1x4x4xbf16> to vector<4x4xbf16>
    %c0_97 = arith.constant 0 : index
    %c19 = arith.constant 19 : index
    %97 = vector.load %arg6[%c0_97, %c19] : memref<4x326xbf16, #tpu.memory_space<vmem>>, vector<4x288xbf16>
    %cst_98 = arith.constant dense<0.000000e+00> : vector<4x288xf32>
    %98 = tpu.matmul %96, %97, %cst_98 {dimension_numbers = #tpu.dot_dimension_numbers<[1], [0], [0], [1], [0, 0, 1, 1], [], []>} : vector<4x4xbf16>, vector<4x288xbf16>, vector<4x288xf32> -> vector<4x288xf32>
    %99 = arith.addf %94, %98 : vector<4x288xf32>
    %c5_99 = arith.constant 5 : index
    %c0_100 = arith.constant 0 : index
    %c0_101 = arith.constant 0 : index
    %100 = vector.load %arg3[%c5_99, %c0_100, %c0_101] : memref<9x4x4xbf16, #tpu.memory_space<vmem>>, vector<1x4x4xbf16>
    %101 = vector.shape_cast %100 : vector<1x4x4xbf16> to vector<4x4xbf16>
    %c0_102 = arith.constant 0 : index
    %c20 = arith.constant 20 : index
    %102 = vector.load %arg6[%c0_102, %c20] : memref<4x326xbf16, #tpu.memory_space<vmem>>, vector<4x288xbf16>
    %cst_103 = arith.constant dense<0.000000e+00> : vector<4x288xf32>
    %103 = tpu.matmul %101, %102, %cst_103 {dimension_numbers = #tpu.dot_dimension_numbers<[1], [0], [0], [1], [0, 0, 1, 1], [], []>} : vector<4x4xbf16>, vector<4x288xbf16>, vector<4x288xf32> -> vector<4x288xf32>
    %104 = arith.addf %99, %103 : vector<4x288xf32>
    %c6_104 = arith.constant 6 : index
    %c0_105 = arith.constant 0 : index
    %c0_106 = arith.constant 0 : index
    %105 = vector.load %arg3[%c6_104, %c0_105, %c0_106] : memref<9x4x4xbf16, #tpu.memory_space<vmem>>, vector<1x4x4xbf16>
    %106 = vector.shape_cast %105 : vector<1x4x4xbf16> to vector<4x4xbf16>
    %c0_107 = arith.constant 0 : index
    %c36_108 = arith.constant 36 : index
    %107 = vector.load %arg6[%c0_107, %c36_108] : memref<4x326xbf16, #tpu.memory_space<vmem>>, vector<4x288xbf16>
    %cst_109 = arith.constant dense<0.000000e+00> : vector<4x288xf32>
    %108 = tpu.matmul %106, %107, %cst_109 {dimension_numbers = #tpu.dot_dimension_numbers<[1], [0], [0], [1], [0, 0, 1, 1], [], []>} : vector<4x4xbf16>, vector<4x288xbf16>, vector<4x288xf32> -> vector<4x288xf32>
    %109 = arith.addf %104, %108 : vector<4x288xf32>
    %c7_110 = arith.constant 7 : index
    %c0_111 = arith.constant 0 : index
    %c0_112 = arith.constant 0 : index
    %110 = vector.load %arg3[%c7_110, %c0_111, %c0_112] : memref<9x4x4xbf16, #tpu.memory_space<vmem>>, vector<1x4x4xbf16>
    %111 = vector.shape_cast %110 : vector<1x4x4xbf16> to vector<4x4xbf16>
    %c0_113 = arith.constant 0 : index
    %c37 = arith.constant 37 : index
    %112 = vector.load %arg6[%c0_113, %c37] : memref<4x326xbf16, #tpu.memory_space<vmem>>, vector<4x288xbf16>
    %cst_114 = arith.constant dense<0.000000e+00> : vector<4x288xf32>
    %113 = tpu.matmul %111, %112, %cst_114 {dimension_numbers = #tpu.dot_dimension_numbers<[1], [0], [0], [1], [0, 0, 1, 1], [], []>} : vector<4x4xbf16>, vector<4x288xbf16>, vector<4x288xf32> -> vector<4x288xf32>
    %114 = arith.addf %109, %113 : vector<4x288xf32>
    %c8 = arith.constant 8 : index
    %c0_115 = arith.constant 0 : index
    %c0_116 = arith.constant 0 : index
    %115 = vector.load %arg3[%c8, %c0_115, %c0_116] : memref<9x4x4xbf16, #tpu.memory_space<vmem>>, vector<1x4x4xbf16>
    %116 = vector.shape_cast %115 : vector<1x4x4xbf16> to vector<4x4xbf16>
    %c0_117 = arith.constant 0 : index
    %c38 = arith.constant 38 : index
    %117 = vector.load %arg6[%c0_117, %c38] : memref<4x326xbf16, #tpu.memory_space<vmem>>, vector<4x288xbf16>
    %cst_118 = arith.constant dense<0.000000e+00> : vector<4x288xf32>
    %118 = tpu.matmul %116, %117, %cst_118 {dimension_numbers = #tpu.dot_dimension_numbers<[1], [0], [0], [1], [0, 0, 1, 1], [], []>} : vector<4x4xbf16>, vector<4x288xbf16>, vector<4x288xf32> -> vector<4x288xf32>
    %119 = arith.addf %114, %118 : vector<4x288xf32>
    %cst_119 = arith.constant 0.000000e+00 : f32
    %120 = vector.broadcast %cst_119 : f32 to vector<4x288xf32>
    %121 = arith.cmpf ogt, %119, %120 : vector<4x288xf32>
    %cst_120 = arith.constant 1.000000e-01 : f32
    %122 = vector.broadcast %cst_120 : f32 to vector<4x288xf32>
    %123 = arith.mulf %122, %119 : vector<4x288xf32>
    %124 = arith.select %121, %119, %123 : vector<4x288xi1>, vector<4x288xf32>
    %125 = vector.extract_strided_slice %124 {offsets = [0, 0], sizes = [4, 16], strides = [1, 1]} : vector<4x288xf32> to vector<4x16xf32>
    %c0_121 = arith.constant 0 : index
    %c0_122 = arith.constant 0 : index
    %c0_123 = arith.constant 0 : index
    %126 = vector.load %arg4[%c0_121, %c0_122, %c0_123] : memref<1x4x256xf32, #tpu.memory_space<vmem>>, vector<1x4x16xf32>
    %127 = vector.shape_cast %126 : vector<1x4x16xf32> to vector<4x16xf32>
    %128 = vector.shape_cast %125 : vector<4x16xf32> to vector<1x4x16xf32>
    tpu.vector_store %arg4[%c0_121, %c0_122, %c0_123], %128 {strides = array<i32>} : memref<1x4x256xf32, #tpu.memory_space<vmem>>, vector<1x4x16xf32>,
    %129 = vector.extract_strided_slice %124 {offsets = [0, 18], sizes = [4, 16], strides = [1, 1]} : vector<4x288xf32> to vector<4x16xf32>
    %c0_124 = arith.constant 0 : index
    %c0_125 = arith.constant 0 : index
    %c16 = arith.constant 16 : index
    %130 = vector.load %arg4[%c0_124, %c0_125, %c16] : memref<1x4x256xf32, #tpu.memory_space<vmem>>, vector<1x4x16xf32>
    %131 = vector.shape_cast %130 : vector<1x4x16xf32> to vector<4x16xf32>
    %132 = vector.shape_cast %129 : vector<4x16xf32> to vector<1x4x16xf32>
    tpu.vector_store %arg4[%c0_124, %c0_125, %c16], %132 {strides = array<i32>} : memref<1x4x256xf32, #tpu.memory_space<vmem>>, vector<1x4x16xf32>,
    %133 = vector.extract_strided_slice %124 {offsets = [0, 36], sizes = [4, 16], strides = [1, 1]} : vector<4x288xf32> to vector<4x16xf32>
    %c0_126 = arith.constant 0 : index
    %c0_127 = arith.constant 0 : index
    %c32 = arith.constant 32 : index
    %134 = vector.load %arg4[%c0_126, %c0_127, %c32] : memref<1x4x256xf32, #tpu.memory_space<vmem>>, vector<1x4x16xf32>
    %135 = vector.shape_cast %134 : vector<1x4x16xf32> to vector<4x16xf32>
    %136 = vector.shape_cast %133 : vector<4x16xf32> to vector<1x4x16xf32>
    tpu.vector_store %arg4[%c0_126, %c0_127, %c32], %136 {strides = array<i32>} : memref<1x4x256xf32, #tpu.memory_space<vmem>>, vector<1x4x16xf32>,
    %137 = vector.extract_strided_slice %124 {offsets = [0, 54], sizes = [4, 16], strides = [1, 1]} : vector<4x288xf32> to vector<4x16xf32>
    %c0_128 = arith.constant 0 : index
    %c0_129 = arith.constant 0 : index
    %c48 = arith.constant 48 : index
    %138 = vector.load %arg4[%c0_128, %c0_129, %c48] : memref<1x4x256xf32, #tpu.memory_space<vmem>>, vector<1x4x16xf32>
    %139 = vector.shape_cast %138 : vector<1x4x16xf32> to vector<4x16xf32>
    %140 = vector.shape_cast %137 : vector<4x16xf32> to vector<1x4x16xf32>
    tpu.vector_store %arg4[%c0_128, %c0_129, %c48], %140 {strides = array<i32>} : memref<1x4x256xf32, #tpu.memory_space<vmem>>, vector<1x4x16xf32>,
    %141 = vector.extract_strided_slice %124 {offsets = [0, 72], sizes = [4, 16], strides = [1, 1]} : vector<4x288xf32> to vector<4x16xf32>
    %c0_130 = arith.constant 0 : index
    %c0_131 = arith.constant 0 : index
    %c64 = arith.constant 64 : index
    %142 = vector.load %arg4[%c0_130, %c0_131, %c64] : memref<1x4x256xf32, #tpu.memory_space<vmem>>, vector<1x4x16xf32>
    %143 = vector.shape_cast %142 : vector<1x4x16xf32> to vector<4x16xf32>
    %144 = vector.shape_cast %141 : vector<4x16xf32> to vector<1x4x16xf32>
    tpu.vector_store %arg4[%c0_130, %c0_131, %c64], %144 {strides = array<i32>} : memref<1x4x256xf32, #tpu.memory_space<vmem>>, vector<1x4x16xf32>,
    %145 = vector.extract_strided_slice %124 {offsets = [0, 90], sizes = [4, 16], strides = [1, 1]} : vector<4x288xf32> to vector<4x16xf32>
    %c0_132 = arith.constant 0 : index
    %c0_133 = arith.constant 0 : index
    %c80 = arith.constant 80 : index
    %146 = vector.load %arg4[%c0_132, %c0_133, %c80] : memref<1x4x256xf32, #tpu.memory_space<vmem>>, vector<1x4x16xf32>
    %147 = vector.shape_cast %146 : vector<1x4x16xf32> to vector<4x16xf32>
    %148 = vector.shape_cast %145 : vector<4x16xf32> to vector<1x4x16xf32>
    tpu.vector_store %arg4[%c0_132, %c0_133, %c80], %148 {strides = array<i32>} : memref<1x4x256xf32, #tpu.memory_space<vmem>>, vector<1x4x16xf32>,
    %149 = vector.extract_strided_slice %124 {offsets = [0, 108], sizes = [4, 16], strides = [1, 1]} : vector<4x288xf32> to vector<4x16xf32>
    %c0_134 = arith.constant 0 : index
    %c0_135 = arith.constant 0 : index
    %c96 = arith.constant 96 : index
    %150 = vector.load %arg4[%c0_134, %c0_135, %c96] : memref<1x4x256xf32, #tpu.memory_space<vmem>>, vector<1x4x16xf32>
    %151 = vector.shape_cast %150 : vector<1x4x16xf32> to vector<4x16xf32>
    %152 = vector.shape_cast %149 : vector<4x16xf32> to vector<1x4x16xf32>
    tpu.vector_store %arg4[%c0_134, %c0_135, %c96], %152 {strides = array<i32>} : memref<1x4x256xf32, #tpu.memory_space<vmem>>, vector<1x4x16xf32>,
    %153 = vector.extract_strided_slice %124 {offsets = [0, 126], sizes = [4, 16], strides = [1, 1]} : vector<4x288xf32> to vector<4x16xf32>
    %c0_136 = arith.constant 0 : index
    %c0_137 = arith.constant 0 : index
    %c112 = arith.constant 112 : index
    %154 = vector.load %arg4[%c0_136, %c0_137, %c112] : memref<1x4x256xf32, #tpu.memory_space<vmem>>, vector<1x4x16xf32>
    %155 = vector.shape_cast %154 : vector<1x4x16xf32> to vector<4x16xf32>
    %156 = vector.shape_cast %153 : vector<4x16xf32> to vector<1x4x16xf32>
    tpu.vector_store %arg4[%c0_136, %c0_137, %c112], %156 {strides = array<i32>} : memref<1x4x256xf32, #tpu.memory_space<vmem>>, vector<1x4x16xf32>,
    %157 = vector.extract_strided_slice %124 {offsets = [0, 144], sizes = [4, 16], strides = [1, 1]} : vector<4x288xf32> to vector<4x16xf32>
    %c0_138 = arith.constant 0 : index
    %c0_139 = arith.constant 0 : index
    %c128 = arith.constant 128 : index
    %158 = vector.load %arg4[%c0_138, %c0_139, %c128] : memref<1x4x256xf32, #tpu.memory_space<vmem>>, vector<1x4x16xf32>
    %159 = vector.shape_cast %158 : vector<1x4x16xf32> to vector<4x16xf32>
    %160 = vector.shape_cast %157 : vector<4x16xf32> to vector<1x4x16xf32>
    tpu.vector_store %arg4[%c0_138, %c0_139, %c128], %160 {strides = array<i32>} : memref<1x4x256xf32, #tpu.memory_space<vmem>>, vector<1x4x16xf32>,
    %161 = vector.extract_strided_slice %124 {offsets = [0, 162], sizes = [4, 16], strides = [1, 1]} : vector<4x288xf32> to vector<4x16xf32>
    %c0_140 = arith.constant 0 : index
    %c0_141 = arith.constant 0 : index
    %c144_142 = arith.constant 144 : index
    %162 = vector.load %arg4[%c0_140, %c0_141, %c144_142] : memref<1x4x256xf32, #tpu.memory_space<vmem>>, vector<1x4x16xf32>
    %163 = vector.shape_cast %162 : vector<1x4x16xf32> to vector<4x16xf32>
    %164 = vector.shape_cast %161 : vector<4x16xf32> to vector<1x4x16xf32>
    tpu.vector_store %arg4[%c0_140, %c0_141, %c144_142], %164 {strides = array<i32>} : memref<1x4x256xf32, #tpu.memory_space<vmem>>, vector<1x4x16xf32>,
    %165 = vector.extract_strided_slice %124 {offsets = [0, 180], sizes = [4, 16], strides = [1, 1]} : vector<4x288xf32> to vector<4x16xf32>
    %c0_143 = arith.constant 0 : index
    %c0_144 = arith.constant 0 : index
    %c160 = arith.constant 160 : index
    %166 = vector.load %arg4[%c0_143, %c0_144, %c160] : memref<1x4x256xf32, #tpu.memory_space<vmem>>, vector<1x4x16xf32>
    %167 = vector.shape_cast %166 : vector<1x4x16xf32> to vector<4x16xf32>
    %168 = vector.shape_cast %165 : vector<4x16xf32> to vector<1x4x16xf32>
    tpu.vector_store %arg4[%c0_143, %c0_144, %c160], %168 {strides = array<i32>} : memref<1x4x256xf32, #tpu.memory_space<vmem>>, vector<1x4x16xf32>,
    %169 = vector.extract_strided_slice %124 {offsets = [0, 198], sizes = [4, 16], strides = [1, 1]} : vector<4x288xf32> to vector<4x16xf32>
    %c0_145 = arith.constant 0 : index
    %c0_146 = arith.constant 0 : index
    %c176 = arith.constant 176 : index
    %170 = vector.load %arg4[%c0_145, %c0_146, %c176] : memref<1x4x256xf32, #tpu.memory_space<vmem>>, vector<1x4x16xf32>
    %171 = vector.shape_cast %170 : vector<1x4x16xf32> to vector<4x16xf32>
    %172 = vector.shape_cast %169 : vector<4x16xf32> to vector<1x4x16xf32>
    tpu.vector_store %arg4[%c0_145, %c0_146, %c176], %172 {strides = array<i32>} : memref<1x4x256xf32, #tpu.memory_space<vmem>>, vector<1x4x16xf32>,
    %173 = vector.extract_strided_slice %124 {offsets = [0, 216], sizes = [4, 16], strides = [1, 1]} : vector<4x288xf32> to vector<4x16xf32>
    %c0_147 = arith.constant 0 : index
    %c0_148 = arith.constant 0 : index
    %c192 = arith.constant 192 : index
    %174 = vector.load %arg4[%c0_147, %c0_148, %c192] : memref<1x4x256xf32, #tpu.memory_space<vmem>>, vector<1x4x16xf32>
    %175 = vector.shape_cast %174 : vector<1x4x16xf32> to vector<4x16xf32>
    %176 = vector.shape_cast %173 : vector<4x16xf32> to vector<1x4x16xf32>
    tpu.vector_store %arg4[%c0_147, %c0_148, %c192], %176 {strides = array<i32>} : memref<1x4x256xf32, #tpu.memory_space<vmem>>, vector<1x4x16xf32>,
    %177 = vector.extract_strided_slice %124 {offsets = [0, 234], sizes = [4, 16], strides = [1, 1]} : vector<4x288xf32> to vector<4x16xf32>
    %c0_149 = arith.constant 0 : index
    %c0_150 = arith.constant 0 : index
    %c208 = arith.constant 208 : index
    %178 = vector.load %arg4[%c0_149, %c0_150, %c208] : memref<1x4x256xf32, #tpu.memory_space<vmem>>, vector<1x4x16xf32>
    %179 = vector.shape_cast %178 : vector<1x4x16xf32> to vector<4x16xf32>
    %180 = vector.shape_cast %177 : vector<4x16xf32> to vector<1x4x16xf32>
    tpu.vector_store %arg4[%c0_149, %c0_150, %c208], %180 {strides = array<i32>} : memref<1x4x256xf32, #tpu.memory_space<vmem>>, vector<1x4x16xf32>,
    %181 = vector.extract_strided_slice %124 {offsets = [0, 252], sizes = [4, 16], strides = [1, 1]} : vector<4x288xf32> to vector<4x16xf32>
    %c0_151 = arith.constant 0 : index
    %c0_152 = arith.constant 0 : index
    %c224 = arith.constant 224 : index
    %182 = vector.load %arg4[%c0_151, %c0_152, %c224] : memref<1x4x256xf32, #tpu.memory_space<vmem>>, vector<1x4x16xf32>
    %183 = vector.shape_cast %182 : vector<1x4x16xf32> to vector<4x16xf32>
    %184 = vector.shape_cast %181 : vector<4x16xf32> to vector<1x4x16xf32>
    tpu.vector_store %arg4[%c0_151, %c0_152, %c224], %184 {strides = array<i32>} : memref<1x4x256xf32, #tpu.memory_space<vmem>>, vector<1x4x16xf32>,
    %185 = vector.extract_strided_slice %124 {offsets = [0, 270], sizes = [4, 16], strides = [1, 1]} : vector<4x288xf32> to vector<4x16xf32>
    %c0_153 = arith.constant 0 : index
    %c0_154 = arith.constant 0 : index
    %c240 = arith.constant 240 : index
    %186 = vector.load %arg4[%c0_153, %c0_154, %c240] : memref<1x4x256xf32, #tpu.memory_space<vmem>>, vector<1x4x16xf32>
    %187 = vector.shape_cast %186 : vector<1x4x16xf32> to vector<4x16xf32>
    %188 = vector.shape_cast %185 : vector<4x16xf32> to vector<1x4x16xf32>
    tpu.vector_store %arg4[%c0_153, %c0_154, %c240], %188 {strides = array<i32>} : memref<1x4x256xf32, #tpu.memory_space<vmem>>, vector<1x4x16xf32>,
    return
  }
  func.func @transform_0(%arg0: i32) -> (i32, i32, i32) {
    %c0_i32 = arith.constant 0 : i32
    %c0_i32_0 = arith.constant 0 : i32
    %c0_i32_1 = arith.constant 0 : i32
    return %arg0, %c0_i32, %c0_i32_0 : i32, i32, i32
  }
  func.func @transform_1(%arg0: i32) -> (i32, i32) {
    %c0_i32 = arith.constant 0 : i32
    %c0_i32_0 = arith.constant 0 : i32
    %c0_i32_1 = arith.constant 0 : i32
    return %c0_i32, %c0_i32_0 : i32, i32
  }
  func.func @transform_2(%arg0: i32) -> (i32, i32, i32) {
    %c0_i32 = arith.constant 0 : i32
    %c0_i32_0 = arith.constant 0 : i32
    %c0_i32_1 = arith.constant 0 : i32
    %c0_i32_2 = arith.constant 0 : i32
    return %c0_i32, %c0_i32_0, %c0_i32_1 : i32, i32, i32
  }
  func.func @transform_3(%arg0: i32) -> (i32, i32, i32) {
    %c0_i32 = arith.constant 0 : i32
    %c0_i32_0 = arith.constant 0 : i32
    %c0_i32_1 = arith.constant 0 : i32
    return %arg0, %c0_i32, %c0_i32_0 : i32, i32, i32
  }
}

</mosaic_0001>

<bundles_post_ra>
// kernel: tpu_custom_call.1
= control target key start
LH: loop header
LB: loop body
LE: loop exit
PB: predicated region body
PF: predicated region fallthrough
CT: control target
= control target key end

     0   :  { %8 = vsyncpa [#allocation5], 0  ;;  %s3905_s0 = inlined_call_operand.vmem [shape: f32[2,32,8], index: 0, kind: input, shape index: {}]   ;;  %s3906_s1 = inlined_call_operand.vmem [shape: f32[8,18], index: 1, kind: input, shape index: {}]   ;;  %s3907_s2 = inlined_call_operand.vmem [shape: bf16[9,4,4], index: 2, kind: input, shape index: {}]   ;;  %s3908_s3 = inlined_call_operand.hbm [shape: f32[2,4,256], index: 3, kind: output, shape index: {}]  }
   0x1   :  { %10 = vsyncpa [#allocation5 + $0x1], 0  ;;  %s3412_s12 = smov 0   ;;  %s3414_s13 = smov 0  }
   0x2   :  { %s3416_s14 = smov 0   ;;  %s3418_s15 = smov 0  }
   0x3 LB: > { %s3433_s16 = sadd.s32 4294967295, %s3354_s15   ;;  %s3006_s17 = sadd.s32 4294967294, %s3354_s15   ;;  %s3354_s15 = sphi %s3418_s15, %s3914_s15   ;;  %s3350_s14 = sphi %s3416_s14, %s3913_s14   ;;  %s3346_s13 = sphi %s3414_s13, %s3912_s13   ;;  %s3342_s12 = sphi %s3412_s12, %s3911_s12  }
   0x4   : > { %s3437_s18 = sadd.s32 1, %s3354_s15   ;;  %s91_s19 = sadd.s32 1, %s3350_s14 }
   0x5   : > { %s88_s20 = ssub.s32 %s3354_s15, %s3437_s18  ;;  %p101_p0 = scmp.ne.s32.totalorder %s3350_s14, %s3346_s13 }
   0x6   : > { %p89_p1 = scmp.eq.s32.totalorder %s88_s20, 0  ;;  %p102_p2 = scmp.eq.s32.totalorder %s3433_s16, 1 }
   0x7   : > { %p107_p3 = scmp.ne.s32.totalorder %s3346_s13, %s3342_s12  ;;  %p108_p4 = scmp.eq.s32.totalorder %s3006_s17, 1 }
   0x8   : > { %s3448_s21 = scalar_select %p89_p1, %s3350_s14, %s91_s19  }
   0x9   : > { %p3450_p5 = por %p102_p2, %p101_p0  ;;  %p3454_p6 = por %p108_p4, %p107_p3 }
   0xa   : > { %p3009_p7 = scmp.ge.s32.totalorder %s3354_s15, 1  ;;  %p140_p8 = scmp.lt.s32.totalorder %s3354_s15, 3 }
   0xc   : > { %p141_p9 = pnand %p3009_p7, %p140_p8 }
   0xd   : > { %v178_v0 = vld [vmem:[%s3906_s1] sm:$0xff] (!%p141_p9)  ;;  %p164_p10 = scmp.lt.s32.totalorder (!%p141_p9), %s3433_s16, 1  ;;  %vm179_vm0 = vcmask (!%p141_p9), 64512   ;;  %vm277_vm1 = vcmask (!%p141_p9), 146432   ;;  %v3356_v5 = vmov (!%p141_p9), 1983009808   ;;  %v297_v7 = vlaneseq (!%p141_p9) }
   0xe   : > { %144 = sbr.rel (%p141_p9) target bundleno = 1069 (0x42d), region = 32  ;;  %3082 = vmatprep.subr.mxu0 (!%p141_p9), %v178_v0  ;;  %3144 = vmatprep.subr.mxu1 (!%p141_p9), %v178_v0  ;;  %v295_v6 = vunpack.c.l.s4 (!%p141_p9), %v3356_v5  ;;  %vm355_vm2 = vcmask (!%p141_p9), 1041409   ;;  %vm358_vm3 = vcmask (!%p141_p9), 1042434   ;;  %vm361_vm4 = vcmask (!%p141_p9), 1043459   ;;  %s3357_s4 = smov (!%p141_p9), 54  }
   0xf   : > { %3083 = vmatpush3.msra.mxu0 (!%p141_p9), %v178_v0  ;;  %3145 = vmatpush3.msra.mxu1 (!%p141_p9), %v178_v0  ;;  %v298_v13 = vshrl.u32 (!%p141_p9), %v297_v7, 7  ;;  %s3358_s5 = smov (!%p141_p9), 18   ;;  %s3359_s6 = smov (!%p141_p9), 72   ;;  %vm170_vm5 = vcmask (!%p141_p9), 140288   ;;  %vm172_vm6 = vcmask (!%p141_p9), 566672   ;;  %vm374_vm7 = vcmask (!%p141_p9), 287888  }
  0x10   : > { %v296_v12 = vunpack.c.0.s8 (!%p141_p9), %v295_v6  ;;  %s3360_s7 = smov (!%p141_p9), 36   ;;  %s3361_s8 = smov (!%p141_p9), 90   ;;  %vm465_vm8 = vcmask (!%p141_p9), 435488   ;;  %vm556_vm9 = vcmask (!%p141_p9), 583088   ;;  %vm647_vm10 = vcmask (!%p141_p9), 730688  }
  0x11   : > { %s3362_s9 = smov (!%p141_p9), 126   ;;  %s3363_s10 = smov (!%p141_p9), 16   ;;  %vm738_vm11 = vcmask (!%p141_p9), 878288   ;;  %vm923_vm12 = vcmask (!%p141_p9), 1042416   ;;  %vm924_vm13 = vcmask (!%p141_p9), 125954   ;;  %vm920_vm14 = vcmask (!%p141_p9), 1031168  }
  0x12   : > { %v3468_v14 = vsub.s32 (!%p141_p9), %v296_v12, %v298_v13  ;;  %s3364_s11 = smov (!%p141_p9), 108   ;;  %s3365_s17 = smov (!%p141_p9), 52   ;;  %vm829_vm15 = vcmask (!%p141_p9), 1025888  }
  0x13   : > { %s3366_s19 = smov (!%p141_p9), 34   ;;  %s3367_s20 = smov (!%p141_p9), 124  }
  0x14   : > { %s3368_s24 = smov (!%p141_p9), 70   ;;  %s3369_s25 = smov (!%p141_p9), 106  }
  0x15   : > { %s165_s26 = scalar_select %p164_p10, %s3433_s16, 1 }
  0x16   : > { %s3373_s28 = smov 14   ;;  %s3376_s29 = smov 127  }
  0x17   : > { %s3057_s27 = sshll.u32 %s165_s26, 5  ;;  %s3370_s26 = smov 88  }
  0x18   : > { %s168_s30 = scalar_lea.vmem %s3905_s0, %s3057_s27  ;;  %s3372_s27 = smov 32  }
  0x19   : > { %v174_v1 = vld [vmem:[%s168_s30] sm:$0xff]  ;;  %v176_v2 = vld [vmem:[%s168_s30 + $0x10] sm:$0xff]  ;;  %v175_v3 = vld [vmem:[%s168_s30 + $0x8] sm:$0xff] }
  0x1a   : > { %3084 = vmatprep.mubr.msk.f32.mxu0 %vm179_vm0, %v174_v1  ;;  %3087 = vmatprep.mubr.msk.f32.mxu1 %vm179_vm0, %v176_v2  ;;  %v177_v4 = vld [vmem:[%s168_s30 + $0x18] sm:$0xff]  ;;  %s3377_s30 = smov 110  }
  0x1b   : > { %3085 = vmatmul.mubr.msk.f32.vlgmr.msra.gmra.mrb[0].mxu0 %vm179_vm0, %v175_v3  ;;  %3088 = vmatmul.mubr.msk.f32.vlgmr.msra.gmra.mrb[0].mxu1 %vm179_vm0, %v177_v4  ;;  %vm925_vm0 = vmor %vm924_vm13, %vm923_vm12  ;;  %vm1749_vm12 = vcmask 402688   ;;  %vm3375_vm13 = vmmov 0  }
  0xee   : > { %v3086_v8 = vpop.f32.mrb[0].mxu0  ;;  %v3089_v9 = vpop.f32.mrb[0].mxu1 }
  0xef   : > { %279 = vst.msk [vmem:[#allocation2 + $0x8] sm:$0xff] %vm277_vm1, %v3086_v8  ;;  %281 = vst.msk [vmem:[#allocation2 + $0x18] sm:$0xff] %vm277_vm1, %v3089_v9  ;;  %v258_v10 = vpop.f32.mrb[1].mxu0  ;;  %v268_v11 = vpop.f32.mrb[1].mxu1 }
  0xf0   : > { %278 = vst.msk [vmem:[#allocation2] sm:$0xff] %vm277_vm1, %v258_v10  ;;  %280 = vst.msk [vmem:[#allocation2 + $0x10] sm:$0xff] %vm277_vm1, %v268_v11  ;;  %vm1016_vm1 = vcmask 271488  }
  0xf6   : > { %v468_v15 = vld [vmem:[#allocation2 + $0x9] sm:$0x1]  ;;  %v470_v16 = vld [vmem:[#allocation2 + $0x19] sm:$0x1]  ;;  %v283_v17 = vld [vmem:[#allocation2 + $0x8] sm:$0x1] }
  0xf7   : > { %v467_v18 = vld [vmem:[#allocation2 + $0x1] sm:$0x1]  ;;  %v469_v19 = vld [vmem:[#allocation2 + $0x11] sm:$0x1]  ;;  %v472_v20 = vpack.c.bf16 %v468_v15, %v468_v15  ;;  %v474_v21 = vpack.c.bf16 %v470_v16, %v470_v16  ;;  %v282_v22 = vld [vmem:[#allocation2] sm:$0x1]  ;;  %v287_v23 = vpack.c.bf16 %v283_v17, %v283_v17 }
  0xf8   : > { %v471_v24 = vpack.c.bf16 %v467_v18, %v467_v18  ;;  %v473_v25 = vpack.c.bf16 %v469_v19, %v469_v19  ;;  %v284_v26 = vld [vmem:[#allocation2 + $0x10] sm:$0x1]  ;;  %v285_v27 = vld [vmem:[#allocation2 + $0x18] sm:$0x1]  ;;  %v286_v28 = vpack.c.bf16 %v282_v22, %v282_v22  ;;  %v558_v49 = vld [vmem:[#allocation2 + $0x1] sm:$0x1] }
  0xf9   : > { %v492_v29 = vrot.slane %v472_v20, %v3468_v14  ;;  %v506_v30 = vrot.slane %v474_v21, %v3468_v14  ;;  %v288_v31 = vpack.c.bf16 %v284_v26, %v284_v26  ;;  %v289_v32 = vpack.c.bf16 %v285_v27, %v285_v27  ;;  %v559_v50 = vld [vmem:[#allocation2 + $0x9] sm:$0x1]  ;;  %v560_v55 = vld [vmem:[#allocation2 + $0x11] sm:$0x1]  ;;  %v561_v60 = vld [vmem:[#allocation2 + $0x19] sm:$0x1] }
  0xfa   : > { %v485_v33 = vrot.slane %v471_v24, %v3468_v14  ;;  %v499_v34 = vrot.slane %v473_v25, %v3468_v14  ;;  %v300_v35 = vrot.slane %v286_v28, %v3468_v14  ;;  %v307_v36 = vrot.slane %v287_v23, %v3468_v14  ;;  %v376_v9 = vld [vmem:[#allocation2] sm:$0x1]  ;;  %v377_v15 = vld [vmem:[#allocation2 + $0x8] sm:$0x1]  ;;  %v378_v20 = vld [vmem:[#allocation2 + $0x10] sm:$0x1] }
  0xfb   : > { %v520_v37 = vrot.slane %v492_v29, %v3468_v14  ;;  %v534_v38 = vrot.slane %v506_v30, %v3468_v14  ;;  %v314_v39 = vrot.slane %v288_v31, %v3468_v14  ;;  %v321_v40 = vrot.slane %v289_v32, %v3468_v14  ;;  %v379_v24 = vld [vmem:[#allocation2 + $0x18] sm:$0x1]  ;;  %v649_v30 = vld [vmem:[#allocation2 + $0x2] sm:$0x1] }
  0xfc   : > { %v513_v41 = vrot.slane %v485_v33, %v3468_v14  ;;  %v527_v42 = vrot.slane %v499_v34, %v3468_v14  ;;  %v328_v43 = vrot.slane %v300_v35, %v3468_v14  ;;  %v335_v44 = vrot.slane %v307_v36, %v3468_v14 }
  0xfd   : > { %v536_v45 = vunpack.c.l.b16 %v520_v37  ;;  %v538_v46 = vunpack.c.l.b16 %v534_v38  ;;  %v342_v47 = vrot.slane %v314_v39, %v3468_v14  ;;  %v349_v48 = vrot.slane %v321_v40, %v3468_v14  ;;  %v650_v39 = vld [vmem:[#allocation2 + $0xa] sm:$0x1]  ;;  %v651_v40 = vld [vmem:[#allocation2 + $0x12] sm:$0x1] }
  0xfe   : > { %v535_v51 = vunpack.c.l.b16 %v513_v41  ;;  %v537_v52 = vunpack.c.l.b16 %v527_v42  ;;  %v350_v53 = vunpack.c.l.b16 %v328_v43  ;;  %v351_v54 = vunpack.c.l.b16 %v335_v44 }
  0xff   : > { %v539_v56 = vrot.slane %v536_v45, 7  ;;  %v543_v57 = vrot.slane %v538_v46, 5  ;;  %v352_v58 = vunpack.c.l.b16 %v342_v47  ;;  %v353_v59 = vunpack.c.l.b16 %v349_v48 }
 0x100   : > { %v541_v61 = vrot.slane %v537_v52, 6  ;;  %v354_v62 = vrot.slane %v351_v54, 7  ;;  %v562_v63 = vpack.c.bf16 %v558_v49, %v558_v49  ;;  %v563_v0 = vpack.c.bf16 %v559_v50, %v559_v50  ;;  %v652_v49 = vld [vmem:[#allocation2 + $0x1a] sm:$0x1] }
 0x101   : > { %v540_v1 = vsel %vm355_vm2, %v539_v56, %v535_v51  ;;  %v357_v2 = vrot.slane %v352_v58, 6  ;;  %v360_v3 = vrot.slane %v353_v59, 5  ;;  %v564_v4 = vpack.c.bf16 %v560_v55, %v560_v55 }
 0x102   : > { %v542_v5 = vsel %vm358_vm3, %v541_v61, %v540_v1  ;;  %v356_v6 = vsel %vm355_vm2, %v354_v62, %v350_v53  ;;  %v565_v7 = vpack.c.bf16 %v561_v60, %v561_v60  ;;  %v576_v8 = vrot.slane %v562_v63, %v3468_v14 }
 0x103   : > { %v544_v10 = vsel %vm361_vm4, %v543_v57, %v542_v5  ;;  %v359_v11 = vsel %vm358_vm3, %v357_v2, %v356_v6  ;;  %v583_v12 = vrot.slane %v563_v0, %v3468_v14  ;;  %v590_v13 = vrot.slane %v564_v4, %v3468_v14  ;;  %v831_v6 = vld [vmem:[#allocation2 + $0x3] sm:$0x1] }
 0x104   : > { %v545_v16 = vpack.c.b16 %v544_v10, %v544_v10  ;;  %v362_v17 = vsel %vm361_vm4, %v360_v3, %v359_v11  ;;  %v597_v18 = vrot.slane %v565_v7, %v3468_v14  ;;  %v604_v19 = vrot.slane %v576_v8, %v3468_v14  ;;  %v832_v7 = vld [vmem:[#allocation2 + $0xb] sm:$0x1] }
 0x105   : > { %v363_v21 = vpack.c.b16 %v362_v17, %v362_v17  ;;  %v611_v22 = vrot.slane %v583_v12, %v3468_v14  ;;  %v618_v23 = vrot.slane %v590_v13, %v3468_v14  ;;  %v380_v25 = vpack.c.bf16 %v376_v9, %v376_v9  ;;  %v833_v12 = vld [vmem:[#allocation2 + $0x13] sm:$0x1] }
 0x106   : > { %v552_v26 = vrot.slane %v545_v16, %v3468_v14  ;;  %v625_v27 = vrot.slane %v597_v18, %v3468_v14  ;;  %v626_v28 = vunpack.c.l.b16 %v604_v19  ;;  %v381_v29 = vpack.c.bf16 %v377_v15, %v377_v15  ;;  %v834_v18 = vld [vmem:[#allocation2 + $0x1b] sm:$0x1] }
 0x107   : > { %v370_v31 = vrot.slane %v363_v21, %v3468_v14  ;;  %v627_v32 = vunpack.c.l.b16 %v611_v22  ;;  %v628_v33 = vunpack.c.l.b16 %v618_v23  ;;  %v382_v34 = vpack.c.bf16 %v378_v20, %v378_v20 }
 0x108   : > { %553 = vrot.lane.b32.xlu1 %v552_v26, %s3357_s4  ;;  %v629_v35 = vunpack.c.l.b16 %v625_v27  ;;  %v383_v36 = vpack.c.bf16 %v379_v24, %v379_v24  ;;  %v394_v37 = vrot.slane %v380_v25, %v3468_v14  ;;  %v401_v38 = vrot.slane %v381_v29, %v3468_v14  ;;  %s3378_s4 = smov 109  }
 0x109   : > { %371 = vrot.lane.b32.xlu0 %v370_v31, %s3358_s5  ;;  %v630_v41 = vrot.slane %v627_v32, 7  ;;  %v632_v42 = vrot.slane %v628_v33, 6  ;;  %v408_v43 = vrot.slane %v382_v34, %v3468_v14  ;;  %v653_v44 = vpack.c.bf16 %v649_v30, %v649_v30  ;;  %v927_v31 = vld [vmem:[#allocation2 + $0x3] sm:$0x1]  ;;  %v928_v32 = vld [vmem:[#allocation2 + $0xb] sm:$0x1] }
 0x10a   : > { %v634_v45 = vrot.slane %v629_v35, 5  ;;  %v415_v46 = vrot.slane %v383_v36, %v3468_v14  ;;  %v422_v47 = vrot.slane %v394_v37, %v3468_v14  ;;  %v429_v48 = vrot.slane %v401_v38, %v3468_v14  ;;  %s3379_s5 = smov 92  }
 0x10b   : > { %v631_v50 = vsel %vm355_vm2, %v630_v41, %v626_v28  ;;  %v436_v51 = vrot.slane %v408_v43, %v3468_v14  ;;  %v654_v52 = vpack.c.bf16 %v650_v39, %v650_v39  ;;  %v655_v53 = vpack.c.bf16 %v651_v40, %v651_v40  ;;  %v929_v41 = vld [vmem:[#allocation2 + $0x13] sm:$0x1] }
 0x10c   : > { %v633_v54 = vsel %vm358_vm3, %v632_v42, %v631_v50  ;;  %v443_v55 = vrot.slane %v415_v46, %v3468_v14  ;;  %v444_v56 = vunpack.c.l.b16 %v422_v47  ;;  %v445_v57 = vunpack.c.l.b16 %v429_v48  ;;  %v930_v42 = vld [vmem:[#allocation2 + $0x1b] sm:$0x1] }
 0x10d   : > { %v635_v58 = vsel %vm361_vm4, %v634_v45, %v633_v54  ;;  %v446_v59 = vunpack.c.l.b16 %v436_v51  ;;  %v656_v60 = vpack.c.bf16 %v652_v49, %v652_v49  ;;  %v667_v61 = vrot.slane %v653_v44, %v3468_v14 }
 0x10e   : > { %v636_v62 = vpack.c.b16 %v635_v58, %v635_v58  ;;  %v447_v63 = vunpack.c.l.b16 %v443_v55  ;;  %v448_v0 = vrot.slane %v445_v57, 7  ;;  %v674_v1 = vrot.slane %v654_v52, %v3468_v14 }
 0x10f   : > { %v450_v2 = vrot.slane %v446_v59, 6  ;;  %v681_v3 = vrot.slane %v655_v53, %v3468_v14  ;;  %v688_v4 = vrot.slane %v656_v60, %v3468_v14  ;;  %v695_v5 = vrot.slane %v667_v61, %v3468_v14  ;;  %v740_v59 = vld [vmem:[#allocation2 + $0x2] sm:$0x1] }
 0x110   : > { %v643_v8 = vrot.slane %v636_v62, %v3468_v14  ;;  %v449_v9 = vsel %vm355_vm2, %v448_v0, %v444_v56  ;;  %v452_v10 = vrot.slane %v447_v63, 5  ;;  %v702_v11 = vrot.slane %v674_v1, %v3468_v14  ;;  %v741_v0 = vld [vmem:[#allocation2 + $0xa] sm:$0x1] }
 0x111   : > { %v451_v13 = vsel %vm358_vm3, %v450_v2, %v449_v9  ;;  %v709_v15 = vrot.slane %v681_v3, %v3468_v14  ;;  %v716_v16 = vrot.slane %v688_v4, %v3468_v14  ;;  %v717_v17 = vunpack.c.l.b16 %v695_v5  ;;  %v742_v5 = vld [vmem:[#allocation2 + $0x12] sm:$0x1]  ;;  %v743_v9 = vld [vmem:[#allocation2 + $0x1a] sm:$0x1] }
 0x112   : > { %644 = vrot.lane.b32.xlu1 %v643_v8, %s3359_s6  ;;  %v453_v19 = vsel %vm361_vm4, %v452_v10, %v451_v13  ;;  %v718_v20 = vunpack.c.l.b16 %v702_v11  ;;  %v835_v21 = vpack.c.bf16 %v831_v6, %v831_v6  ;;  %v836_v22 = vpack.c.bf16 %v832_v7, %v832_v7  ;;  %s3380_s6 = smov 91  }
 0x113   : > { %v454_v23 = vpack.c.b16 %v453_v19, %v453_v19  ;;  %v719_v24 = vunpack.c.l.b16 %v709_v15  ;;  %v720_v25 = vunpack.c.l.b16 %v716_v16  ;;  %v837_v26 = vpack.c.bf16 %v833_v12, %v833_v12 }
 0x114   : > { %v721_v27 = vrot.slane %v718_v20, 7  ;;  %v838_v28 = vpack.c.bf16 %v834_v18, %v834_v18  ;;  %v849_v29 = vrot.slane %v835_v21, %v3468_v14  ;;  %v856_v30 = vrot.slane %v836_v22, %v3468_v14 }
 0x115   : > { %v461_v33 = vrot.slane %v454_v23, %v3468_v14  ;;  %v723_v34 = vrot.slane %v719_v24, 6  ;;  %v725_v35 = vrot.slane %v720_v25, 5  ;;  %v863_v36 = vrot.slane %v837_v26, %v3468_v14  ;;  %v1109_v24 = vld [vmem:[#allocation2 + $0x4] sm:$0x1]  ;;  %v1110_v25 = vld [vmem:[#allocation2 + $0xc] sm:$0x1] }
 0x116   : > { %v722_v37 = vsel %vm355_vm2, %v721_v27, %v717_v17  ;;  %v870_v38 = vrot.slane %v838_v28, %v3468_v14  ;;  %v877_v39 = vrot.slane %v849_v29, %v3468_v14  ;;  %v884_v40 = vrot.slane %v856_v30, %v3468_v14 }
 0x117   : > { %462 = vrot.lane.b32.xlu0 %v461_v33, %s3360_s7  ;;  %v724_v43 = vsel %vm358_vm3, %v723_v34, %v722_v37  ;;  %v891_v44 = vrot.slane %v863_v36, %v3468_v14  ;;  %v931_v45 = vpack.c.bf16 %v927_v31, %v927_v31  ;;  %v932_v46 = vpack.c.bf16 %v928_v32, %v928_v32  ;;  %v1111_v34 = vld [vmem:[#allocation2 + $0x14] sm:$0x1]  ;;  %s3387_s7 = smov 114  }
 0x118   : > { %v726_v47 = vsel %vm361_vm4, %v725_v35, %v724_v43  ;;  %v898_v48 = vrot.slane %v870_v38, %v3468_v14  ;;  %v899_v49 = vunpack.c.l.b16 %v877_v39  ;;  %v900_v50 = vunpack.c.l.b16 %v884_v40  ;;  %v1112_v35 = vld [vmem:[#allocation2 + $0x1c] sm:$0x1] }
 0x119   : > { %v727_v51 = vpack.c.b16 %v726_v47, %v726_v47  ;;  %v901_v52 = vunpack.c.l.b16 %v891_v44  ;;  %v933_v53 = vpack.c.bf16 %v929_v41, %v929_v41  ;;  %v934_v54 = vpack.c.bf16 %v930_v42, %v930_v42 }
 0x11a   : > { %v902_v55 = vunpack.c.l.b16 %v898_v48  ;;  %v903_v56 = vrot.slane %v900_v50, 7  ;;  %v945_v57 = vrot.slane %v931_v45, %v3468_v14  ;;  %v952_v58 = vrot.slane %v932_v46, %v3468_v14 }
 0x11b   : > { %v734_v60 = vrot.slane %v727_v51, %v3468_v14  ;;  %v905_v61 = vrot.slane %v901_v52, 6  ;;  %v959_v62 = vrot.slane %v933_v53, %v3468_v14  ;;  %v966_v63 = vrot.slane %v934_v54, %v3468_v14  ;;  %v1018_v52 = vld [vmem:[#allocation2 + $0x4] sm:$0x1] }
 0x11c   : > { %v904_v1 = vsel %vm355_vm2, %v903_v56, %v899_v49  ;;  %v907_v2 = vrot.slane %v902_v55, 5  ;;  %v973_v3 = vrot.slane %v945_v57, %v3468_v14  ;;  %v980_v4 = vrot.slane %v952_v58, %v3468_v14  ;;  %v1019_v57 = vld [vmem:[#allocation2 + $0xc] sm:$0x1] }
 0x11d   : > { %735 = vrot.lane.b32.xlu1 %v734_v60, %s3361_s8  ;;  %v906_v6 = vsel %vm358_vm3, %v905_v61, %v904_v1  ;;  %v987_v7 = vrot.slane %v959_v62, %v3468_v14  ;;  %v994_v8 = vrot.slane %v966_v63, %v3468_v14  ;;  %v744_v10 = vpack.c.bf16 %v740_v59, %v740_v59  ;;  %v1020_v62 = vld [vmem:[#allocation2 + $0x14] sm:$0x1] }
 0x11e   : > { %v908_v11 = vsel %vm361_vm4, %v907_v2, %v906_v6  ;;  %v995_v12 = vunpack.c.l.b16 %v973_v3  ;;  %v996_v13 = vunpack.c.l.b16 %v980_v4  ;;  %v745_v15 = vpack.c.bf16 %v741_v0, %v741_v0  ;;  %v1021_v2 = vld [vmem:[#allocation2 + $0x1c] sm:$0x1] }
 0x11f   : > { %v909_v16 = vpack.c.b16 %v908_v11, %v908_v11  ;;  %v997_v17 = vunpack.c.l.b16 %v987_v7  ;;  %v998_v18 = vunpack.c.l.b16 %v994_v8  ;;  %v746_v19 = vpack.c.bf16 %v742_v5, %v742_v5 }
 0x120   : > { %v999_v20 = vrot.slane %v996_v13, 7  ;;  %v747_v21 = vpack.c.bf16 %v743_v9, %v743_v9  ;;  %v758_v22 = vrot.slane %v744_v10, %v3468_v14  ;;  %v765_v23 = vrot.slane %v745_v15, %v3468_v14 }
 0x121   : > { %v916_v26 = vrot.slane %v909_v16, %v3468_v14  ;;  %v1001_v27 = vrot.slane %v997_v17, 6  ;;  %v1003_v28 = vrot.slane %v998_v18, 5  ;;  %v772_v29 = vrot.slane %v746_v19, %v3468_v14  ;;  %v1473_v17 = vld [vmem:[#allocation2 + $0x6] sm:$0x1]  ;;  %v1474_v18 = vld [vmem:[#allocation2 + $0xe] sm:$0x1] }
 0x122   : > { %v1000_v30 = vsel %vm355_vm2, %v999_v20, %v995_v12  ;;  %v779_v31 = vrot.slane %v747_v21, %v3468_v14  ;;  %v786_v32 = vrot.slane %v758_v22, %v3468_v14  ;;  %v793_v33 = vrot.slane %v765_v23, %v3468_v14 }
 0x123   : > { %917 = vrot.lane.b32.xlu0 %v916_v26, %s3362_s9  ;;  %v1002_v36 = vsel %vm358_vm3, %v1001_v27, %v1000_v30  ;;  %v800_v37 = vrot.slane %v772_v29, %v3468_v14  ;;  %v1113_v38 = vpack.c.bf16 %v1109_v24, %v1109_v24  ;;  %v1114_v39 = vpack.c.bf16 %v1110_v25, %v1110_v25  ;;  %v1475_v27 = vld [vmem:[#allocation2 + $0x16] sm:$0x1] }
 0x124   : > { %v1004_v40 = vsel %vm361_vm4, %v1003_v28, %v1002_v36  ;;  %v807_v41 = vrot.slane %v779_v31, %v3468_v14  ;;  %v808_v42 = vunpack.c.l.b16 %v786_v32  ;;  %v809_v43 = vunpack.c.l.b16 %v793_v33  ;;  %v1476_v28 = vld [vmem:[#allocation2 + $0x1e] sm:$0x1] }
 0x125   : > { %v1005_v44 = vpack.c.b16 %v1004_v40, %v1004_v40  ;;  %v810_v45 = vunpack.c.l.b16 %v800_v37  ;;  %v1115_v46 = vpack.c.bf16 %v1111_v34, %v1111_v34  ;;  %v1116_v47 = vpack.c.bf16 %v1112_v35, %v1112_v35 }
 0x126   : > { %v811_v48 = vunpack.c.l.b16 %v807_v41  ;;  %v812_v49 = vrot.slane %v809_v43, 7  ;;  %v1127_v50 = vrot.slane %v1113_v38, %v3468_v14  ;;  %v1134_v51 = vrot.slane %v1114_v39, %v3468_v14 }
 0x127   : > { %v1012_v53 = vrot.slane %v1005_v44, %v3468_v14  ;;  %v814_v54 = vrot.slane %v810_v45, 6  ;;  %v1141_v55 = vrot.slane %v1115_v46, %v3468_v14  ;;  %v1148_v56 = vrot.slane %v1116_v47, %v3468_v14  ;;  %v1200_v45 = vld [vmem:[#allocation2 + $0x5] sm:$0x1] }
 0x128   : > { %v813_v58 = vsel %vm355_vm2, %v812_v49, %v808_v42  ;;  %v816_v59 = vrot.slane %v811_v48, 5  ;;  %v1155_v60 = vrot.slane %v1127_v50, %v3468_v14  ;;  %v1162_v61 = vrot.slane %v1134_v51, %v3468_v14  ;;  %v1201_v50 = vld [vmem:[#allocation2 + $0xd] sm:$0x1] }
 0x129   : > { %1013 = vrot.lane.b32.xlu1 %v1012_v53, %s3363_s10  ;;  %v815_v63 = vsel %vm358_vm3, %v814_v54, %v813_v58  ;;  %v1169_v0 = vrot.slane %v1141_v55, %v3468_v14  ;;  %v1176_v1 = vrot.slane %v1148_v56, %v3468_v14  ;;  %v1022_v3 = vpack.c.bf16 %v1018_v52, %v1018_v52  ;;  %v1202_v55 = vld [vmem:[#allocation2 + $0x15] sm:$0x1]  ;;  %s3389_s10 = smov 116  }
 0x12a   : > { %v817_v4 = vsel %vm361_vm4, %v816_v59, %v815_v63  ;;  %v1177_v5 = vunpack.c.l.b16 %v1155_v60  ;;  %v1178_v6 = vunpack.c.l.b16 %v1162_v61  ;;  %v1023_v7 = vpack.c.bf16 %v1019_v57, %v1019_v57  ;;  %v1203_v59 = vld [vmem:[#allocation2 + $0x1d] sm:$0x1] }
 0x12b   : > { %v818_v8 = vpack.c.b16 %v817_v4, %v817_v4  ;;  %v1179_v9 = vunpack.c.l.b16 %v1169_v0  ;;  %v1180_v10 = vunpack.c.l.b16 %v1176_v1  ;;  %v1024_v11 = vpack.c.bf16 %v1020_v62, %v1020_v62 }
 0x12c   : > { %v1181_v12 = vrot.slane %v1178_v6, 7  ;;  %v1025_v13 = vpack.c.bf16 %v1021_v2, %v1021_v2  ;;  %v1036_v15 = vrot.slane %v1022_v3, %v3468_v14  ;;  %v1043_v16 = vrot.slane %v1023_v7, %v3468_v14 }
 0x12d   : > { %v825_v19 = vrot.slane %v818_v8, %v3468_v14  ;;  %v1183_v20 = vrot.slane %v1179_v9, 6  ;;  %v1185_v21 = vrot.slane %v1180_v10, 5  ;;  %v1050_v22 = vrot.slane %v1024_v11, %v3468_v14  ;;  %v1382_v9 = vld [vmem:[#allocation2 + $0x6] sm:$0x1]  ;;  %v1383_v10 = vld [vmem:[#allocation2 + $0xe] sm:$0x1] }
 0x12e   : > { %v1182_v23 = vsel %vm355_vm2, %v1181_v12, %v1177_v5  ;;  %v1057_v24 = vrot.slane %v1025_v13, %v3468_v14  ;;  %v1064_v25 = vrot.slane %v1036_v15, %v3468_v14  ;;  %v1071_v26 = vrot.slane %v1043_v16, %v3468_v14 }
 0x12f   : > { %826 = vrot.lane.b32.xlu0 %v825_v19, %s3364_s11  ;;  %v1184_v29 = vsel %vm358_vm3, %v1183_v20, %v1182_v23  ;;  %v1078_v30 = vrot.slane %v1050_v22, %v3468_v14  ;;  %v1477_v31 = vpack.c.bf16 %v1473_v17, %v1473_v17  ;;  %v1478_v32 = vpack.c.bf16 %v1474_v18, %v1474_v18  ;;  %v1384_v20 = vld [vmem:[#allocation2 + $0x16] sm:$0x1] }
 0x130   : > { %v1186_v33 = vsel %vm361_vm4, %v1185_v21, %v1184_v29  ;;  %v1085_v34 = vrot.slane %v1057_v24, %v3468_v14  ;;  %v1086_v35 = vunpack.c.l.b16 %v1064_v25  ;;  %v1087_v36 = vunpack.c.l.b16 %v1071_v26  ;;  %v1385_v21 = vld [vmem:[#allocation2 + $0x1e] sm:$0x1] }
 0x131   : > { %v1187_v37 = vpack.c.b16 %v1186_v33, %v1186_v33  ;;  %v1088_v38 = vunpack.c.l.b16 %v1078_v30  ;;  %v1479_v39 = vpack.c.bf16 %v1475_v27, %v1475_v27  ;;  %v1480_v40 = vpack.c.bf16 %v1476_v28, %v1476_v28 }
 0x132   : > { %v1089_v41 = vunpack.c.l.b16 %v1085_v34  ;;  %v1090_v42 = vrot.slane %v1087_v36, 7  ;;  %v1491_v43 = vrot.slane %v1477_v31, %v3468_v14  ;;  %v1498_v44 = vrot.slane %v1478_v32, %v3468_v14 }
 0x133   : > { %v1194_v46 = vrot.slane %v1187_v37, %v3468_v14  ;;  %v1092_v47 = vrot.slane %v1088_v38, 6  ;;  %v1505_v48 = vrot.slane %v1479_v39, %v3468_v14  ;;  %v1512_v49 = vrot.slane %v1480_v40, %v3468_v14  ;;  %v1291_v38 = vld [vmem:[#allocation2 + $0x5] sm:$0x1] }
 0x134   : > { %v1091_v51 = vsel %vm355_vm2, %v1090_v42, %v1086_v35  ;;  %v1094_v52 = vrot.slane %v1089_v41, 5  ;;  %v1519_v53 = vrot.slane %v1491_v43, %v3468_v14  ;;  %v1526_v54 = vrot.slane %v1498_v44, %v3468_v14  ;;  %v1292_v43 = vld [vmem:[#allocation2 + $0xd] sm:$0x1] }
 0x135   : > { %1195 = vrot.lane.b32.xlu1 %v1194_v46, %s3365_s17  ;;  %v1093_v56 = vsel %vm358_vm3, %v1092_v47, %v1091_v51  ;;  %v1533_v57 = vrot.slane %v1505_v48, %v3468_v14  ;;  %v1540_v58 = vrot.slane %v1512_v49, %v3468_v14  ;;  %v1204_v60 = vpack.c.bf16 %v1200_v45, %v1200_v45  ;;  %v1293_v48 = vld [vmem:[#allocation2 + $0x15] sm:$0x1] }
 0x136   : > { %v1095_v61 = vsel %vm361_vm4, %v1094_v52, %v1093_v56  ;;  %v1541_v62 = vunpack.c.l.b16 %v1519_v53  ;;  %v1542_v63 = vunpack.c.l.b16 %v1526_v54  ;;  %v1205_v0 = vpack.c.bf16 %v1201_v50, %v1201_v50  ;;  %v1294_v52 = vld [vmem:[#allocation2 + $0x1d] sm:$0x1] }
 0x137   : > { %v1096_v1 = vpack.c.b16 %v1095_v61, %v1095_v61  ;;  %v1543_v2 = vunpack.c.l.b16 %v1533_v57  ;;  %v1544_v3 = vunpack.c.l.b16 %v1540_v58  ;;  %v1206_v4 = vpack.c.bf16 %v1202_v55, %v1202_v55 }
 0x138   : > { %v1545_v5 = vrot.slane %v1542_v63, 7  ;;  %v1207_v6 = vpack.c.bf16 %v1203_v59, %v1203_v59  ;;  %v1218_v7 = vrot.slane %v1204_v60, %v3468_v14  ;;  %v1225_v8 = vrot.slane %v1205_v0, %v3468_v14 }
 0x139   : > { %v1103_v11 = vrot.slane %v1096_v1, %v3468_v14  ;;  %v1547_v12 = vrot.slane %v1543_v2, 6  ;;  %v1549_v13 = vrot.slane %v1544_v3, 5  ;;  %v1232_v15 = vrot.slane %v1206_v4, %v3468_v14  ;;  %v1660_v2 = vld [vmem:[#allocation2 + $0x7] sm:$0x1]  ;;  %v1661_v3 = vld [vmem:[#allocation2 + $0xf] sm:$0x1] }
 0x13a   : > { %v1546_v16 = vsel %vm355_vm2, %v1545_v5, %v1541_v62  ;;  %v1239_v17 = vrot.slane %v1207_v6, %v3468_v14  ;;  %v1246_v18 = vrot.slane %v1218_v7, %v3468_v14  ;;  %v1253_v19 = vrot.slane %v1225_v8, %v3468_v14 }
 0x13b   : > { %1104 = vrot.lane.b32.xlu0 %v1103_v11, %s3366_s19  ;;  %v1548_v22 = vsel %vm358_vm3, %v1547_v12, %v1546_v16  ;;  %v1260_v23 = vrot.slane %v1232_v15, %v3468_v14  ;;  %v1386_v24 = vpack.c.bf16 %v1382_v9, %v1382_v9  ;;  %v1387_v25 = vpack.c.bf16 %v1383_v10, %v1383_v10  ;;  %v1662_v12 = vld [vmem:[#allocation2 + $0x17] sm:$0x1] }
 0x13c   : > { %v1550_v26 = vsel %vm361_vm4, %v1549_v13, %v1548_v22  ;;  %v1267_v27 = vrot.slane %v1239_v17, %v3468_v14  ;;  %v1268_v28 = vunpack.c.l.b16 %v1246_v18  ;;  %v1269_v29 = vunpack.c.l.b16 %v1253_v19  ;;  %v1663_v13 = vld [vmem:[#allocation2 + $0x1f] sm:$0x1] }
 0x13d   : > { %v1551_v30 = vpack.c.b16 %v1550_v26, %v1550_v26  ;;  %v1270_v31 = vunpack.c.l.b16 %v1260_v23  ;;  %v1388_v32 = vpack.c.bf16 %v1384_v20, %v1384_v20  ;;  %v1389_v33 = vpack.c.bf16 %v1385_v21, %v1385_v21 }
 0x13e   : > { %v1271_v34 = vunpack.c.l.b16 %v1267_v27  ;;  %v1272_v35 = vrot.slane %v1269_v29, 7  ;;  %v1400_v36 = vrot.slane %v1386_v24, %v3468_v14  ;;  %v1407_v37 = vrot.slane %v1387_v25, %v3468_v14 }
 0x13f   : > { %v1558_v39 = vrot.slane %v1551_v30, %v3468_v14  ;;  %v1274_v40 = vrot.slane %v1270_v31, 6  ;;  %v1414_v41 = vrot.slane %v1388_v32, %v3468_v14  ;;  %v1421_v42 = vrot.slane %v1389_v33, %v3468_v14  ;;  %v1569_v31 = vld [vmem:[#allocation2 + $0x7] sm:$0x1] }
 0x140   : > { %v1273_v44 = vsel %vm355_vm2, %v1272_v35, %v1268_v28  ;;  %v1276_v45 = vrot.slane %v1271_v34, 5  ;;  %v1428_v46 = vrot.slane %v1400_v36, %v3468_v14  ;;  %v1435_v47 = vrot.slane %v1407_v37, %v3468_v14  ;;  %v1570_v36 = vld [vmem:[#allocation2 + $0xf] sm:$0x1] }
 0x141   : > { %1559 = vrot.lane.b32.xlu1 %v1558_v39, %s3367_s20  ;;  %v1275_v49 = vsel %vm358_vm3, %v1274_v40, %v1273_v44  ;;  %v1442_v50 = vrot.slane %v1414_v41, %v3468_v14  ;;  %v1449_v51 = vrot.slane %v1421_v42, %v3468_v14  ;;  %v1295_v53 = vpack.c.bf16 %v1291_v38, %v1291_v38  ;;  %v1571_v41 = vld [vmem:[#allocation2 + $0x17] sm:$0x1] }
 0x142   : > { %v1277_v54 = vsel %vm361_vm4, %v1276_v45, %v1275_v49  ;;  %v1450_v55 = vunpack.c.l.b16 %v1428_v46  ;;  %v1451_v56 = vunpack.c.l.b16 %v1435_v47  ;;  %v1296_v57 = vpack.c.bf16 %v1292_v43, %v1292_v43  ;;  %v1572_v45 = vld [vmem:[#allocation2 + $0x1f] sm:$0x1] }
 0x143   : > { %v1278_v58 = vpack.c.b16 %v1277_v54, %v1277_v54  ;;  %v1452_v59 = vunpack.c.l.b16 %v1442_v50  ;;  %v1453_v60 = vunpack.c.l.b16 %v1449_v51  ;;  %v1297_v61 = vpack.c.bf16 %v1293_v48, %v1293_v48 }
 0x144   : > { %v1454_v62 = vrot.slane %v1451_v56, 7  ;;  %v1298_v63 = vpack.c.bf16 %v1294_v52, %v1294_v52  ;;  %v1309_v0 = vrot.slane %v1295_v53, %v3468_v14  ;;  %v1316_v1 = vrot.slane %v1296_v57, %v3468_v14 }
 0x145   : > { %v1285_v4 = vrot.slane %v1278_v58, %v3468_v14  ;;  %v1456_v5 = vrot.slane %v1452_v59, 6  ;;  %v1458_v6 = vrot.slane %v1453_v60, 5  ;;  %v1323_v7 = vrot.slane %v1297_v61, %v3468_v14 }
 0x146   : > { %v1455_v8 = vsel %vm355_vm2, %v1454_v62, %v1450_v55  ;;  %v1330_v9 = vrot.slane %v1298_v63, %v3468_v14  ;;  %v1337_v10 = vrot.slane %v1309_v0, %v3468_v14  ;;  %v1344_v11 = vrot.slane %v1316_v1, %v3468_v14 }
 0x147   : > { %1286 = vrot.lane.b32.xlu0 %v1285_v4, %s3368_s24  ;;  %v1457_v15 = vsel %vm358_vm3, %v1456_v5, %v1455_v8  ;;  %v1351_v16 = vrot.slane %v1323_v7, %v3468_v14  ;;  %v1664_v17 = vpack.c.bf16 %v1660_v2, %v1660_v2  ;;  %v1665_v18 = vpack.c.bf16 %v1661_v3, %v1661_v3  ;;  %s161_s24 = sand.u32 1, %s3346_s13  }
 0x148   : > { %v1459_v19 = vsel %vm361_vm4, %v1458_v6, %v1457_v15  ;;  %v1358_v20 = vrot.slane %v1330_v9, %v3468_v14  ;;  %v1359_v21 = vunpack.c.l.b16 %v1337_v10  ;;  %v1360_v22 = vunpack.c.l.b16 %v1344_v11 }
 0x149   : > { %v1460_v23 = vpack.c.b16 %v1459_v19, %v1459_v19  ;;  %v1361_v24 = vunpack.c.l.b16 %v1351_v16  ;;  %v1666_v25 = vpack.c.bf16 %v1662_v12, %v1662_v12  ;;  %v1667_v26 = vpack.c.bf16 %v1663_v13, %v1663_v13 }
 0x14a   : > { %v1362_v27 = vunpack.c.l.b16 %v1358_v20  ;;  %v1363_v28 = vrot.slane %v1360_v22, 7  ;;  %v1678_v29 = vrot.slane %v1664_v17, %v3468_v14  ;;  %v1685_v30 = vrot.slane %v1665_v18, %v3468_v14 }
 0x14b   : > { %v1467_v32 = vrot.slane %v1460_v23, %v3468_v14  ;;  %v1365_v33 = vrot.slane %v1361_v24, 6  ;;  %v1692_v34 = vrot.slane %v1666_v25, %v3468_v14  ;;  %v1699_v35 = vrot.slane %v1667_v26, %v3468_v14 }
 0x14c   : > { %v1364_v37 = vsel %vm355_vm2, %v1363_v28, %v1359_v21  ;;  %v1367_v38 = vrot.slane %v1362_v27, 5  ;;  %v1706_v39 = vrot.slane %v1678_v29, %v3468_v14  ;;  %v1713_v40 = vrot.slane %v1685_v30, %v3468_v14 }
 0x14d   : > { %1468 = vrot.lane.b32.xlu1 %v1467_v32, %s3369_s25  ;;  %v1366_v42 = vsel %vm358_vm3, %v1365_v33, %v1364_v37  ;;  %v1720_v43 = vrot.slane %v1692_v34, %v3468_v14  ;;  %v1727_v44 = vrot.slane %v1699_v35, %v3468_v14  ;;  %v1573_v46 = vpack.c.bf16 %v1569_v31, %v1569_v31 }
 0x14e   : > { %v1368_v47 = vsel %vm361_vm4, %v1367_v38, %v1366_v42  ;;  %v1728_v48 = vunpack.c.l.b16 %v1706_v39  ;;  %v1729_v49 = vunpack.c.l.b16 %v1713_v40  ;;  %v1574_v50 = vpack.c.bf16 %v1570_v36, %v1570_v36 }
 0x14f   : > { %v1369_v51 = vpack.c.b16 %v1368_v47, %v1368_v47  ;;  %v1730_v52 = vunpack.c.l.b16 %v1720_v43  ;;  %v1731_v53 = vunpack.c.l.b16 %v1727_v44  ;;  %v1575_v54 = vpack.c.bf16 %v1571_v41, %v1571_v41 }
 0x150   : > { %v1732_v55 = vrot.slane %v1729_v49, 7  ;;  %v1576_v56 = vpack.c.bf16 %v1572_v45, %v1572_v45  ;;  %v1587_v57 = vrot.slane %v1573_v46, %v3468_v14  ;;  %v1594_v58 = vrot.slane %v1574_v50, %v3468_v14 }
 0x151   : > { %v1376_v59 = vrot.slane %v1369_v51, %v3468_v14  ;;  %v1734_v60 = vrot.slane %v1730_v52, 6  ;;  %v1736_v61 = vrot.slane %v1731_v53, 5  ;;  %v1601_v62 = vrot.slane %v1575_v54, %v3468_v14 }
 0x152   : > { %v1733_v63 = vsel %vm355_vm2, %v1732_v55, %v1728_v48  ;;  %v1608_v0 = vrot.slane %v1576_v56, %v3468_v14  ;;  %v1615_v1 = vrot.slane %v1587_v57, %v3468_v14  ;;  %v1622_v2 = vrot.slane %v1594_v58, %v3468_v14 }
 0x153   : > { %1377 = vrot.lane.b32.xlu0 %v1376_v59, %s3370_s26  ;;  %v1735_v3 = vsel %vm358_vm3, %v1734_v60, %v1733_v63  ;;  %v1629_v4 = vrot.slane %v1601_v62, %v3468_v14  ;;  %v3371_v9 = vmov 0   ;;  %v3374_v43 = vmov 0.0   ;;  %s3010_s26 = sshll.u32 %s161_s24, 3 }
 0x154   : > { %v1737_v5 = vsel %vm361_vm4, %v1736_v61, %v1735_v3  ;;  %v1636_v6 = vrot.slane %v1608_v0, %v3468_v14  ;;  %v1637_v7 = vunpack.c.l.b16 %v1615_v1  ;;  %v1638_v8 = vunpack.c.l.b16 %v1622_v2  ;;  %171 = vst.msk [vmem:[#allocation3] sm:$0x3] %vm170_vm5, %v3371_v9  ;;  %1827 = vmatprep.mubr.bf16.mxu1 %v3371_v9  ;;  %3090 = vmatprep.subr.bf16.mxu0 %v3374_v43 }
 0x155   : > { %v1738_v10 = vpack.c.b16 %v1737_v5, %v1737_v5  ;;  %v1639_v11 = vunpack.c.l.b16 %v1629_v4  ;;  %173 = vst.msk [vmem:[#allocation3 + $0x4] sm:$0x3] %vm172_vm6, %v3371_v9  ;;  %vm1565_vm5 = vcmask 1042400   ;;  %vm1566_vm6 = vcmask 109570   ;;  %3092 = vmatprep.mubr.msk.bf16.mxu0 %vm3375_vm13, %v3374_v43 }
 0x156   : > { %v1640_v12 = vunpack.c.l.b16 %v1636_v6  ;;  %v1641_v13 = vrot.slane %v1638_v8, 7 }
 0x157   : > { %v1745_v15 = vrot.slane %v1738_v10, %v3468_v14  ;;  %v1643_v16 = vrot.slane %v1639_v11, 6 }
 0x158   : > { %v1642_v17 = vsel %vm355_vm2, %v1641_v13, %v1637_v7  ;;  %v1645_v18 = vrot.slane %v1640_v12, 5  ;;  %vm1107_vm2 = vcmask 419088  }
 0x159   : > { %1746 = vrot.lane.b32.xlu1 %v1745_v15, %s3372_s27  ;;  %v1644_v19 = vsel %vm358_vm3, %v1643_v16, %v1642_v17  ;;  %vm1198_vm3 = vcmask 566688   ;;  %s3381_s27 = smov 120  }
 0x15a   : > { %v1646_v20 = vsel %vm361_vm4, %v1645_v18, %v1644_v19  ;;  %vm1289_vm4 = vcmask 714288  }
 0x15b   : > { %v1647_v21 = vpack.c.b16 %v1646_v20, %v1646_v20 }
 0x15d   : > { %v1654_v22 = vrot.slane %v1647_v21, %v3468_v14 }
 0x15f   : > { %1655 = vrot.lane.b32.xlu0 %v1654_v22, %s3373_s28  ;;  %s3826_s28 = scalar_lea.vmem [#allocation4], %s3010_s26 }
 0x17a   : > { %v554_v24 = vpop.permute.xlu1 %553 }
 0x17b   : > { %v372_v23 = vpop.permute.xlu0 %371 }
 0x17c   : > { %375 = vst.msk [vmem:[#allocation3] sm:$0x3] %vm374_vm7, %v372_v23  ;;  %vm1380_vm7 = vcmask 861888  }
 0x184   : > { %v645_v25 = vpop.permute.xlu1 %644 }
 0x189   : > { %v463_v26 = vpop.permute.xlu0 %462 }
 0x18a   : > { %466 = vst.msk [vmem:[#allocation3] sm:$0x3] %vm465_vm8, %v463_v26  ;;  %vm1562_vm8 = vcmask 1014784  }
 0x18b   : > { %557 = vst.msk [vmem:[#allocation3] sm:$0x3] %vm556_vm9, %v554_v24  ;;  %vm1471_vm9 = vcmask 1009488  }
 0x18c   : > { %648 = vst.msk [vmem:[#allocation3] sm:$0x3] %vm647_vm10, %v645_v25  ;;  %vm1567_vm10 = vmor %vm1566_vm6, %vm1565_vm5  ;;  %vm2619_vm5 = vcmask 744448   ;;  %vm2744_vm6 = vcmask 736256  }
 0x18f   : > { %v736_v27 = vpop.permute.xlu1 %735 }
 0x190   : > { %739 = vst.msk [vmem:[#allocation3] sm:$0x3] %vm738_vm11, %v736_v27  ;;  %vm1658_vm11 = vcmask 255088  }
 0x195   : > { %v918_v28 = vpop.permute.xlu0 %917 }
 0x196   : > { %v919_v29 = vrot.slane %v918_v28, 6 }
 0x198   : > { %v921_v31 = vsel %vm920_vm14, %v919_v29, %v918_v28 }
 0x19b   : > { %v1014_v32 = vpop.permute.xlu1 %1013 }
 0x1a1   : > { %v827_v30 = vpop.permute.xlu0 %826 }
 0x1a2   : > { %830 = vst.msk [vmem:[#allocation3] sm:$0x3] %vm829_vm15, %v827_v30  ;;  %vm1778_vm15 = vcmask 1039360  }
 0x1a3   : > { %926 = vst.msk [vmem:[#allocation3] sm:$0xf] %vm925_vm0, %v921_v31  ;;  %vm1785_vm0 = vcmask 1041408  }
 0x1a4   : > { %1017 = vst.msk [vmem:[#allocation3 + $0x2] sm:$0x3] %vm1016_vm1, %v1014_v32  ;;  %vm1781_vm1 = vcmask 31744  }
 0x1a7   : > { %v1196_v33 = vpop.permute.xlu1 %1195 }
 0x1ad   : > { %v1105_v34 = vpop.permute.xlu0 %1104 }
 0x1ae   : > { %1108 = vst.msk [vmem:[#allocation3 + $0x2] sm:$0x3] %vm1107_vm2, %v1105_v34  ;;  %vm2119_vm2 = vcmask 900096  }
 0x1af   : > { %1199 = vst.msk [vmem:[#allocation3 + $0x2] sm:$0x3] %vm1198_vm3, %v1196_v33  ;;  %vm2369_vm3 = vcmask 883712  }
 0x1b3   : > { %v1560_v36 = vpop.permute.xlu1 %1559 }
 0x1b4   : > { %v1561_v37 = vrot.slane %v1560_v36, 6 }
 0x1b6   : > { %v1563_v40 = vsel %vm1562_vm8, %v1561_v37, %v1560_v36  ;;  %v1751_v36 = vld [vmem:[%s3907_s2] sm:$0x3] }
 0x1b9   : > { %v1287_v35 = vpop.permute.xlu0 %1286 }
 0x1ba   : > { %1290 = vst.msk [vmem:[#allocation3 + $0x2] sm:$0x3] %vm1289_vm4, %v1287_v35  ;;  %vm2494_vm4 = vcmask 752640  }
 0x1bf   : > { %v1469_v38 = vpop.permute.xlu1 %1468 }
 0x1c5   : > { %v1378_v39 = vpop.permute.xlu0 %1377 }
 0x1c6   : > { %1381 = vst.msk [vmem:[#allocation3 + $0x2] sm:$0x3] %vm1380_vm7, %v1378_v39  ;;  %vm2852_vm7 = vcmask 125952  }
 0x1c7   : > { %1472 = vst.msk [vmem:[#allocation3 + $0x2] sm:$0x3] %vm1471_vm9, %v1469_v38 }
 0x1c8   : > { %1568 = vst.msk [vmem:[#allocation3 + $0x2] sm:$0xf] %vm1567_vm10, %v1563_v40 }
 0x1cb   : > { %v1747_v41 = vpop.permute.xlu1 %1746 }
 0x1d1   : > { %v1656_v42 = vpop.permute.xlu0 %1655 }
 0x1d2   : > { %1659 = vst.msk [vmem:[#allocation3 + $0x4] sm:$0x3] %vm1658_vm11, %v1656_v42  ;;  %vm2858_vm11 = vcmask 257152  }
 0x1d3   : > { %1750 = vst.msk [vmem:[#allocation3 + $0x4] sm:$0x3] %vm1749_vm12, %v1747_v41  ;;  %vm2863_vm12 = vcmask 388352  }
 0x1da   : > { %v1752_v44 = vld [vmem:[#allocation3] sm:$0x3f] }
 0x1db   : > { %v3675_v45 = vrot.slane %v1752_v44, %v3468_v14  ;;  %v1756_v46 = vcombine.high %v1752_v44, %v1752_v44  ;;  %v1971_v47 = vld [vmem:[#allocation3] sm:$0x3f] }
 0x1dc   : > { %v1980_v50 = vrot.slane %v1971_v47, %v3468_v14  ;;  %v1973_v51 = vcombine.high %v1971_v47, %v1971_v47  ;;  %v2095_v52 = vld [vmem:[#allocation3] sm:$0x3f] }
 0x1dd   : > { %1772 = vrot.lane.b32.xlu0 %v3675_v45, %s3376_s29  ;;  %v3680_v48 = vcombine.high %v3675_v45, %v3675_v45  ;;  %v3684_v49 = vrot.slane %v1756_v46, %v3468_v14  ;;  %v2104_v55 = vrot.slane %v2095_v52, %v3468_v14  ;;  %v2097_v56 = vcombine.high %v2095_v52, %v2095_v52  ;;  %v2220_v57 = vld [vmem:[#allocation3] sm:$0x3f] }
 0x1de   : > { %v1988_v53 = vcombine.high %v1980_v50, %v1980_v50  ;;  %v1987_v54 = vrot.slane %v1973_v51, %v3468_v14  ;;  %v2229_v60 = vrot.slane %v2220_v57, %v3468_v14  ;;  %v2222_v61 = vcombine.high %v2220_v57, %v2220_v57  ;;  %v2345_v62 = vld [vmem:[#allocation3] sm:$0x3f] }
 0x1df   : > { %1774 = vrot.lane.b32.xlu1 %v3680_v48, %s3376_s29  ;;  %v2112_v58 = vcombine.high %v2104_v55, %v2104_v55  ;;  %v2111_v59 = vrot.slane %v2097_v56, %v3468_v14  ;;  %v2354_v1 = vrot.slane %v2345_v62, %v3468_v14  ;;  %v2347_v2 = vcombine.high %v2345_v62, %v2345_v62  ;;  %v2470_v3 = vld [vmem:[#allocation3] sm:$0x3f] }
 0x1e0   : > { %v2237_v63 = vcombine.high %v2229_v60, %v2229_v60  ;;  %v2236_v0 = vrot.slane %v2222_v61, %v3468_v14  ;;  %v2479_v6 = vrot.slane %v2470_v3, %v3468_v14  ;;  %v2472_v7 = vcombine.high %v2470_v3, %v2470_v3  ;;  %v2595_v8 = vld [vmem:[#allocation3] sm:$0x3f]  ;;  %v3032_v61 = vld [vmem:[%s3907_s2 + $0x8] sm:$0x3] }
 0x1e1   : > { %1776 = vrot.lane.b32.xlu0 %v3684_v49, %s3376_s29  ;;  %v2362_v4 = vcombine.high %v2354_v1, %v2354_v1  ;;  %v2361_v5 = vrot.slane %v2347_v2, %v3468_v14  ;;  %v2604_v12 = vrot.slane %v2595_v8, %v3468_v14  ;;  %v2597_v13 = vcombine.high %v2595_v8, %v2595_v8  ;;  %v2720_v15 = vld [vmem:[#allocation3] sm:$0x3f]  ;;  %s3382_s29 = smov 112  }
 0x1e2   : > { %v2487_v10 = vcombine.high %v2479_v6, %v2479_v6  ;;  %v2486_v11 = vrot.slane %v2472_v7, %v3468_v14  ;;  %v2729_v18 = vrot.slane %v2720_v15, %v3468_v14  ;;  %v2722_v19 = vcombine.high %v2720_v15, %v2720_v15  ;;  %v3040_v15 = vld [vmem:[%s3907_s2 + $0xc] sm:$0x3] }
 0x1e3   : > { %1989 = vrot.lane.b32.xlu1 %v1980_v50, %s3362_s9  ;;  %v2612_v16 = vcombine.high %v2604_v12, %v2604_v12  ;;  %v2611_v17 = vrot.slane %v2597_v13, %v3468_v14  ;;  %v1886_v31 = vsel %vm1785_vm0, %v3684_v49, 0  ;;  %v1880_v33 = vsel %vm1785_vm0, %v3675_v45, 0  ;;  %v3024_v45 = vld [vmem:[%s3907_s2 + $0x4] sm:$0x3] }
 0x1e4   : > { %v2737_v20 = vcombine.high %v2729_v18, %v2729_v18  ;;  %v2736_v21 = vrot.slane %v2722_v19, %v3468_v14  ;;  %v3017_v14 = vld [vmem:[%s3907_s2 + $0x2] sm:$0x3] }
 0x1e5   : > { %1991 = vrot.lane.b32.xlu0 %v1988_v53, %s3362_s9  ;;  %v3028_v53 = vld [vmem:[%s3907_s2 + $0x6] sm:$0x3] }
 0x1e7   : > { %1993 = vrot.lane.b32.xlu1 %v1987_v54, %s3362_s9 }
 0x1e9   : > { %2113 = vrot.lane.b32.xlu0 %v2104_v55, %s3377_s30 }
 0x1eb   : > { %2115 = vrot.lane.b32.xlu1 %v2112_v58, %s3377_s30 }
 0x1ed   : > { %2117 = vrot.lane.b32.xlu0 %v2111_v59, %s3377_s30 }
 0x1ef   : > { %2238 = vrot.lane.b32.xlu1 %v2229_v60, %s3378_s4 }
 0x1f1   : > { %2240 = vrot.lane.b32.xlu0 %v2237_v63, %s3378_s4 }
 0x1f3   : > { %2242 = vrot.lane.b32.xlu1 %v2236_v0, %s3378_s4  ;;  %s3383_s4 = smov 122  }
 0x1f5   : > { %2363 = vrot.lane.b32.xlu0 %v2354_v1, %s3364_s11 }
 0x1f7   : > { %2365 = vrot.lane.b32.xlu1 %v2362_v4, %s3364_s11 }
 0x1f9   : > { %2367 = vrot.lane.b32.xlu0 %v2361_v5, %s3364_s11  ;;  %v3036_v5 = vld [vmem:[%s3907_s2 + $0xa] sm:$0x3] }
 0x1fb   : > { %2488 = vrot.lane.b32.xlu1 %v2479_v6, %s3379_s5 }
 0x1fd   : > { %2490 = vrot.lane.b32.xlu0 %v2487_v10, %s3379_s5 }
 0x1ff   : > { %2492 = vrot.lane.b32.xlu1 %v2486_v11, %s3379_s5  ;;  %s3384_s5 = smov 118  }
 0x201   : > { %2613 = vrot.lane.b32.xlu0 %v2604_v12, %s3380_s6 }
 0x203   : > { %2615 = vrot.lane.b32.xlu1 %v2612_v16, %s3380_s6 }
 0x205   : > { %2617 = vrot.lane.b32.xlu0 %v2611_v17, %s3380_s6  ;;  %s3386_s6 = smov 104  }
 0x207   : > { %2738 = vrot.lane.b32.xlu1 %v2729_v18, %s3361_s8 }
 0x209   : > { %2740 = vrot.lane.b32.xlu0 %v2737_v20, %s3361_s8 }
 0x20b   : > { %2742 = vrot.lane.b32.xlu1 %v2736_v21, %s3361_s8 }
 0x24f   : > { %v1773_v22 = vpop.permute.xlu0 %1772 }
 0x251   : > { %v1775_v23 = vpop.permute.xlu1 %1774 }
 0x252   : > { %v1779_v24 = vsel %vm1778_vm15, %v1773_v22, %v1775_v23  ;;  %v3044_v22 = vld [vmem:[%s3907_s2 + $0xe] sm:$0x3] }
 0x253   : > { %v1777_v25 = vpop.permute.xlu0 %1776  ;;  %v1787_v28 = vsel %vm1785_vm0, %v1779_v24, 0 }
 0x254   : > { %v1780_v26 = vsel %vm1778_vm15, %v1775_v23, %v1777_v25  ;;  %v1793_v27 = vsel %vm1785_vm0, %v1777_v25, 0  ;;  %vm2873_vm15 = vcmask 650752  }
 0x255   : > { %v1990_v29 = vpop.permute.xlu1 %1989  ;;  %3018 = vmatprep.subr.msk.bf16.mxu1 %vm1785_vm0, %v1780_v26  ;;  %3091 = vmatpush3.bf16.msra.mxu0 %v1793_v27  ;;  %v3048_v26 = vld [vmem:[%s3907_s2 + $0x10] sm:$0x3] }
 0x256   : > { %1796 = vmatpush1.bf16.msra.mxu1 %v1787_v28  ;;  %3096 = vmatprep.subr.bf16.mxu0 %v3374_v43 }
 0x257   : > { %3021 = vmatprep.subr.msk.bf16.mxu1 %vm1785_vm0, %v3680_v48  ;;  %v1992_v30 = vpop.permute.xlu0 %1991 }
 0x258   : > { %3093 = vmatmul.mubr.msk.bf16.vlgmr.msra.gmra.mrb[4].mxu0 %vm1781_vm1, %v3017_v14  ;;  %v1995_v37 = vsel %vm920_vm14, %v1990_v29, %v1992_v30 }
 0x259   : > { %v1994_v32 = vpop.permute.xlu1 %1993  ;;  %3019 = vmatmul.mubr.msk.bf16.vlgmr.msra.gmra.mrb[4].mxu1 %vm1781_vm1, %v3017_v14  ;;  %3097 = vmatpush3.bf16.msra.mxu0 %v1886_v31  ;;  %v2001_v41 = vsel %vm1785_vm0, %v1995_v37, 0 }
 0x25a   : > { %v1996_v34 = vsel %vm920_vm14, %v1992_v30, %v1994_v32  ;;  %1889 = vmatpush1.bf16.msra.mxu1 %v1880_v33  ;;  %3098 = vmatprep.mubr.msk.bf16.mxu0 %vm3375_vm13, %v3374_v43  ;;  %v2007_v40 = vsel %vm1785_vm0, %v1994_v32, 0  ;;  %vm2244_vm14 = vcmask 891904  }
 0x25b   : > { %3025 = vmatprep.subr.msk.bf16.mxu1 %vm1785_vm0, %v1996_v34  ;;  %3102 = vmatprep.subr.bf16.mxu0 %v3374_v43  ;;  %v2114_v35 = vpop.permute.xlu0 %2113 }
 0x25c   : > { %1920 = vmatprep.mubr.bf16.mxu1 %v3371_v9 }
 0x25d   : > { %v2116_v38 = vpop.permute.xlu1 %2115 }
 0x25e   : > { %v2120_v46 = vsel %vm2119_vm2, %v2114_v35, %v2116_v38 }
 0x25f   : > { %v2118_v39 = vpop.permute.xlu0 %2117  ;;  %v2126_v50 = vsel %vm1785_vm0, %v2120_v46, 0 }
 0x260   : > { %v2121_v42 = vsel %vm2119_vm2, %v2116_v38, %v2118_v39  ;;  %v2132_v49 = vsel %vm1785_vm0, %v2118_v39, 0  ;;  %vm2890_vm2 = vcmask 932864  }
 0x261   : > { %v2239_v44 = vpop.permute.xlu1 %2238 }
 0x263   : > { %v2241_v47 = vpop.permute.xlu0 %2240 }
 0x264   : > { %3099 = vmatmul.mubr.msk.bf16.vlgmr.msra.gmra.mrb[4].mxu0 %vm1781_vm1, %v1751_v36  ;;  %v2245_v54 = vsel %vm2244_vm14, %v2239_v44, %v2241_v47 }
 0x265   : > { %3103 = vmatpush3.bf16.msra.mxu0 %v2007_v40  ;;  %3022 = vmatmul.mubr.msk.bf16.vlgmr.msra.gmra.mrb[4].mxu1 %vm1781_vm1, %v1751_v36  ;;  %v2243_v48 = vpop.permute.xlu1 %2242  ;;  %v2251_v58 = vsel %vm1785_vm0, %v2245_v54, 0 }
 0x266   : > { %2010 = vmatpush1.bf16.msra.mxu1 %v2001_v41  ;;  %3104 = vmatprep.mubr.msk.bf16.mxu0 %vm3375_vm13, %v3374_v43  ;;  %v2246_v51 = vsel %vm2244_vm14, %v2241_v47, %v2243_v48  ;;  %v2257_v57 = vsel %vm1785_vm0, %v2243_v48, 0  ;;  %vm2883_vm14 = vcmask 913152  }
 0x267   : > { %3029 = vmatprep.subr.msk.bf16.mxu1 %vm1785_vm0, %v2121_v42  ;;  %3108 = vmatprep.subr.bf16.mxu0 %v3374_v43  ;;  %v2364_v52 = vpop.permute.xlu0 %2363 }
 0x268   : > { %2041 = vmatprep.mubr.bf16.mxu1 %v3371_v9 }
 0x269   : > { %v2366_v55 = vpop.permute.xlu1 %2365 }
 0x26a   : > { %v2370_v62 = vsel %vm2369_vm3, %v2364_v52, %v2366_v55 }
 0x26b   : > { %v2368_v56 = vpop.permute.xlu0 %2367  ;;  %v2376_v2 = vsel %vm1785_vm0, %v2370_v62, 0 }
 0x26c   : > { %v2371_v59 = vsel %vm2369_vm3, %v2366_v55, %v2368_v56  ;;  %v2382_v1 = vsel %vm1785_vm0, %v2368_v56, 0  ;;  %vm2893_vm3 = vcmask 1044352  }
 0x26d   : > { %v2489_v60 = vpop.permute.xlu1 %2488 }
 0x26f   : > { %v2491_v63 = vpop.permute.xlu0 %2490 }
 0x270   : > { %3105 = vmatmul.mubr.msk.bf16.vlgmr.msra.gmra.mrb[4].mxu0 %vm1781_vm1, %v3024_v45  ;;  %v2495_v6 = vsel %vm2494_vm4, %v2489_v60, %v2491_v63 }
 0x271   : > { %3109 = vmatpush3.bf16.msra.mxu0 %v2132_v49  ;;  %3026 = vmatmul.mubr.msk.bf16.vlgmr.msra.gmra.mrb[4].mxu1 %vm1781_vm1, %v3024_v45  ;;  %v2493_v0 = vpop.permute.xlu1 %2492  ;;  %v2501_v11 = vsel %vm1785_vm0, %v2495_v6, 0 }
 0x272   : > { %2135 = vmatpush1.bf16.msra.mxu1 %v2126_v50  ;;  %3110 = vmatprep.mubr.msk.bf16.mxu0 %vm3375_vm13, %v3374_v43  ;;  %v2496_v3 = vsel %vm2494_vm4, %v2491_v63, %v2493_v0  ;;  %v2507_v10 = vsel %vm1785_vm0, %v2493_v0, 0 }
 0x273   : > { %3033 = vmatprep.subr.msk.bf16.mxu1 %vm1785_vm0, %v2246_v51  ;;  %3114 = vmatprep.subr.bf16.mxu0 %v3374_v43  ;;  %v2614_v4 = vpop.permute.xlu0 %2613 }
 0x274   : > { %2166 = vmatprep.mubr.bf16.mxu1 %v3371_v9 }
 0x275   : > { %v2616_v7 = vpop.permute.xlu1 %2615 }
 0x276   : > { %v2620_v16 = vsel %vm2619_vm5, %v2614_v4, %v2616_v7 }
 0x277   : > { %v2618_v8 = vpop.permute.xlu0 %2617  ;;  %v2626_v19 = vsel %vm1785_vm0, %v2620_v16, 0 }
 0x278   : > { %v2621_v12 = vsel %vm2619_vm5, %v2616_v7, %v2618_v8  ;;  %v2632_v18 = vsel %vm1785_vm0, %v2618_v8, 0 }
 0x279   : > { %v2739_v13 = vpop.permute.xlu1 %2738 }
 0x27b   : > { %v2741_v20 = vpop.permute.xlu0 %2740 }
 0x27c   : > { %3111 = vmatmul.mubr.msk.bf16.vlgmr.msra.gmra.mrb[4].mxu0 %vm1781_vm1, %v3028_v53  ;;  %v2745_v23 = vsel %vm2744_vm6, %v2739_v13, %v2741_v20 }
 0x27d   : > { %3115 = vmatpush3.bf16.msra.mxu0 %v2257_v57  ;;  %3030 = vmatmul.mubr.msk.bf16.vlgmr.msra.gmra.mrb[4].mxu1 %vm1781_vm1, %v3028_v53  ;;  %v2743_v17 = vpop.permute.xlu1 %2742  ;;  %v2751_v25 = vsel %vm1785_vm0, %v2745_v23, 0 }
 0x27e   : > { %2260 = vmatpush1.bf16.msra.mxu1 %v2251_v58  ;;  %3116 = vmatprep.mubr.msk.bf16.mxu0 %vm3375_vm13, %v3374_v43  ;;  %v2746_v21 = vsel %vm2744_vm6, %v2741_v20, %v2743_v17  ;;  %v2757_v24 = vsel %vm1785_vm0, %v2743_v17, 0 }
 0x27f   : > { %3037 = vmatprep.subr.msk.bf16.mxu1 %vm1785_vm0, %v2371_v59  ;;  %3120 = vmatprep.subr.bf16.mxu0 %v3374_v43 }
 0x280   : > { %2291 = vmatprep.mubr.bf16.mxu1 %v3371_v9 }
 0x288   : > { %3117 = vmatmul.mubr.msk.bf16.vlgmr.msra.gmra.mrb[4].mxu0 %vm1781_vm1, %v3032_v61 }
 0x289   : > { %3121 = vmatpush3.bf16.msra.mxu0 %v2382_v1  ;;  %3034 = vmatmul.mubr.msk.bf16.vlgmr.msra.gmra.mrb[4].mxu1 %vm1781_vm1, %v3032_v61 }
 0x28a   : > { %2385 = vmatpush1.bf16.msra.mxu1 %v2376_v2  ;;  %3122 = vmatprep.mubr.msk.bf16.mxu0 %vm3375_vm13, %v3374_v43 }
 0x28b   : > { %3041 = vmatprep.subr.msk.bf16.mxu1 %vm1785_vm0, %v2496_v3  ;;  %3126 = vmatprep.subr.bf16.mxu0 %v3374_v43 }
 0x28c   : > { %2416 = vmatprep.mubr.bf16.mxu1 %v3371_v9 }
 0x294   : > { %3123 = vmatmul.mubr.msk.bf16.vlgmr.msra.gmra.mrb[4].mxu0 %vm1781_vm1, %v3036_v5 }
 0x295   : > { %3127 = vmatpush3.bf16.msra.mxu0 %v2507_v10  ;;  %3038 = vmatmul.mubr.msk.bf16.vlgmr.msra.gmra.mrb[4].mxu1 %vm1781_vm1, %v3036_v5 }
 0x296   : > { %2510 = vmatpush1.bf16.msra.mxu1 %v2501_v11  ;;  %3128 = vmatprep.mubr.msk.bf16.mxu0 %vm3375_vm13, %v3374_v43 }
 0x297   : > { %3045 = vmatprep.subr.msk.bf16.mxu1 %vm1785_vm0, %v2621_v12  ;;  %3132 = vmatprep.subr.bf16.mxu0 %v3374_v43 }
 0x298   : > { %2541 = vmatprep.mubr.bf16.mxu1 %v3371_v9 }
 0x2a0   : > { %3129 = vmatmul.mubr.msk.bf16.vlgmr.msra.gmra.mrb[4].mxu0 %vm1781_vm1, %v3040_v15 }
 0x2a1   : > { %3133 = vmatpush3.bf16.msra.mxu0 %v2632_v18  ;;  %3042 = vmatmul.mubr.msk.bf16.vlgmr.msra.gmra.mrb[4].mxu1 %vm1781_vm1, %v3040_v15 }
 0x2a2   : > { %2635 = vmatpush1.bf16.msra.mxu1 %v2626_v19  ;;  %3134 = vmatprep.mubr.msk.bf16.mxu0 %vm3375_vm13, %v3374_v43 }
 0x2a3   : > { %3049 = vmatprep.subr.msk.bf16.mxu1 %vm1785_vm0, %v2746_v21  ;;  %3138 = vmatprep.subr.bf16.mxu0 %v3374_v43  ;;  %vm2878_vm0 = vcmask 781952  }
 0x2a4   : > { %2666 = vmatprep.mubr.bf16.mxu1 %v3371_v9 }
 0x2ac   : > { %3135 = vmatmul.mubr.msk.bf16.vlgmr.msra.gmra.mrb[4].mxu0 %vm1781_vm1, %v3044_v22 }
 0x2ad   : > { %3139 = vmatpush3.bf16.msra.mxu0 %v2757_v24  ;;  %3046 = vmatmul.mubr.msk.bf16.vlgmr.msra.gmra.mrb[4].mxu1 %vm1781_vm1, %v3044_v22 }
 0x2ae   : > { %2760 = vmatpush1.bf16.msra.mxu1 %v2751_v25  ;;  %3140 = vmatprep.mubr.msk.bf16.mxu0 %vm3375_vm13, %v3374_v43  ;;  %vm2868_vm13 = vcmask 519552  }
 0x2af   : > { %2791 = vmatprep.mubr.bf16.mxu1 %v3371_v9 }
 0x2b8   : > { %3141 = vmatmul.mubr.msk.bf16.vlgmr.msra.gmra.mrb[4].mxu0 %vm1781_vm1, %v3048_v26 }
 0x2b9   : > { %3050 = vmatmul.mubr.msk.bf16.vlgmr.msra.gmra.mrb[4].mxu1 %vm1781_vm1, %v3048_v26  ;;  %vm2924_vm1 = vcmask 818176  }
 0x38b   : > { %v2834_v27 = vpop.f32.mrb[4].mxu0 }
 0x38c   : > { %v2848_v28 = vmul.f32 0.1, %v2834_v27  ;;  %v2793_v29 = vpop.f32.mrb[4].mxu1  ;;  %v3142_v14 = vpop.f32.mrb[5].mxu0  ;;  %vm2845_vm8 = vcmp.gt.f32.partialorder %v2834_v27, 0.0 }
 0x38d   : > { %vm2843_vm9 = vcmp.gt.f32.partialorder %v2793_v29, 0.0  ;;  %v2846_v43 = vmul.f32 0.1, %v2793_v29  ;;  %v2795_v9 = vpop.f32.mrb[5].mxu1  ;;  %v2837_v30 = vpop.f32.mrb[6].mxu0 }
 0x38e   : > { %vm2844_vm10 = vcmp.gt.f32.partialorder %v2795_v9, 0.0  ;;  %v2847_v31 = vmul.f32 0.1, %v2795_v9  ;;  %v2797_v32 = vpop.f32.mrb[6].mxu1  ;;  %v3143_v33 = vpop.f32.mrb[7].mxu0  ;;  %v2851_v36 = vsel %vm2845_vm8, %v2834_v27, %v2848_v28 }
 0x38f   : > { %v2849_v34 = vsel %vm2843_vm9, %v2793_v29, %v2846_v43  ;;  %v2798_v35 = vpop.f32.mrb[7].mxu1 }
 0x390   : > { %v2850_v37 = vsel %vm2844_vm10, %v2795_v9, %v2847_v31  ;;  %2870 = vrot.lane.b32.xlu0 %v2849_v34, %s3381_s27  ;;  %2855 = vrot.lane.b32.xlu1 %v2849_v34, %s3362_s9  ;;  %2853 = vst.msk [vmem:[%s3826_s28] sm:$0xf] %vm2852_vm7, %v2849_v34  ;;  %s3385_s9 = smov 100   ;;  %s3391_s27 = smov [#allocation4]  }
 0x391   : > { %v2920_v38 = vcombine.low %v2850_v37, %v2851_v36  ;;  %v2886_v39 = vcombine.low %v2849_v34, %v2850_v37 }
 0x394   : > { %2860 = vrot.lane.b32.xlu1 %v2849_v34, %s3367_s20  ;;  %2895 = vrot.lane.b32.xlu0 %v2850_v37, %s3382_s29  ;;  %s3388_s20 = smov 102   ;;  %s3296_s29 = sshll.u32 %s3391_s27, 4  ;;  %s3297_s29 = int_to_ptr.vmem [resolvable:$false] %s3296_s29 }
 0x398   : > { %2865 = vrot.lane.b32.xlu1 %v2849_v34, %s3383_s4  ;;  %2899 = vrot.lane.b32.xlu0 %v2850_v37, %s3377_s30  ;;  %s3390_s30 = smov 98   ;;  %s3298_s4 = scalar_lea.vmem %s3297_s29, 256 }
 0x39c   : > { %2875 = vrot.lane.b32.xlu1 %v2849_v34, %s3384_s5  ;;  %2903 = vrot.lane.b32.xlu0 %v2850_v37, %s3364_s11  ;;  %s3058_s11 = sshll.u32 %s3433_s16, 7  ;;  %s2933_s16 = scalar_lea.sflag [#allocation5], %s161_s24 }
 0x39d   : > { %s3860_s19 = scalar_lea.hbm %s3908_s3, %s3058_s11 }
 0x3a0   : > { %2907 = vrot.lane.b32.xlu0 %v2850_v37, %s3369_s25  ;;  %2921 = vrot.lane.b32.xlu1 %v2920_v38, %s3385_s9  ;;  %s2947_s25 = sshll.u32 %s3826_s28, 4  ;;  %s3862_s25 = int_to_ptr.vmem [resolvable:$true] %s2947_s25 }
 0x3a1   : > { %s3292_s26 = scalar_lea.vmem %s3862_s25, 128  ;;  %p3299_p0 = scmp.lt.s32.totalorder %s3862_s25, %s3297_s29 }
 0x3a2   : > { %p3293_p11 = scmp.ne.s32.totalorder %s3862_s25, %s3292_s26  ;;  %p3300_p1 = scmp.lt.s32.totalorder %s3298_s4, %s3292_s26 }
 0x3a4   : > { %2911 = vrot.lane.b32.xlu0 %v2850_v37, %s3386_s6  ;;  %2887 = vrot.lane.b32.xlu1 %v2886_v39, %s3387_s7  ;;  %p3294_p12 = pnand %p3293_p11, %p3450_p5  ;;  %p3301_p2 = por %p3300_p1, %p3299_p0 }
 0x3a6   : > { %p3295_p13 = pneg %p3294_p12 }
 0x3a8   : > { %2915 = vrot.lane.b32.xlu0 %v2850_v37, %s3388_s20  ;;  %2880 = vrot.lane.b32.xlu1 %v2849_v34, %s3389_s10  ;;  %p3302_p3 = pnand %p3301_p2, %p3295_p13 }
 0x3ac   : > { %2928 = vrot.lane.b32.xlu0 %v2851_v36, %s3390_s30 }
 0x402   : > { %v2871_v40 = vpop.permute.xlu0 %2870  ;;  %v2856_v41 = vpop.permute.xlu1 %2855 }
 0x403   : > { %2859 = vst.msk [vmem:[%s3826_s28] sm:$0xf] %vm2858_vm11, %v2856_v41 }
 0x406   : > { %v2861_v42 = vpop.permute.xlu1 %2860  ;;  %v2896_v44 = vpop.permute.xlu0 %2895 }
 0x407   : > { %2864 = vst.msk [vmem:[%s3826_s28] sm:$0xf] %vm2863_vm12, %v2861_v42 }
 0x408   : > { %2898 = vst.msk [vmem:[%s3826_s28 + $0x4] sm:$0xf] %vm2852_vm7, %v2896_v44 }
 0x40a   : > { %v2866_v45 = vpop.permute.xlu1 %2865  ;;  %v2900_v46 = vpop.permute.xlu0 %2899 }
 0x40b   : > { %2869 = vst.msk [vmem:[%s3826_s28] sm:$0xf] %vm2868_vm13, %v2866_v45 }
 0x40c   : > { %2902 = vst.msk [vmem:[%s3826_s28 + $0x4] sm:$0xf] %vm2858_vm11, %v2900_v46 }
 0x40d   : > { %2874 = vst.msk [vmem:[%s3826_s28] sm:$0xf] %vm2873_vm15, %v2871_v40 }
 0x40e   : > { %v2876_v47 = vpop.permute.xlu1 %2875  ;;  %v2904_v48 = vpop.permute.xlu0 %2903 }
 0x40f   : > { %2879 = vst.msk [vmem:[%s3826_s28] sm:$0xf] %vm2878_vm0, %v2876_v47 }
 0x410   : > { %2906 = vst.msk [vmem:[%s3826_s28 + $0x4] sm:$0xf] %vm2863_vm12, %v2904_v48 }
 0x412   : > { %v2908_v49 = vpop.permute.xlu0 %2907  ;;  %v2922_v50 = vpop.permute.xlu1 %2921 }
 0x413   : > { %2910 = vst.msk [vmem:[%s3826_s28 + $0x4] sm:$0xf] %vm2868_vm13, %v2908_v49  ;;  %v2923_v53 = vrot.slane %v2922_v50, 4 }
 0x415   : > { %v2925_v57 = vsel %vm2924_vm1, %v2922_v50, %v2923_v53 }
 0x416   : > { %v2912_v51 = vpop.permute.xlu0 %2911  ;;  %v2888_v52 = vpop.permute.xlu1 %2887 }
 0x417   : > { %2914 = vst.msk [vmem:[%s3826_s28 + $0x4] sm:$0xf] %vm2873_vm15, %v2912_v51  ;;  %v2889_v54 = vrot.slane %v2888_v52, 4 }
 0x419   : > { %v2891_v58 = vsel %vm2890_vm2, %v2888_v52, %v2889_v54 }
 0x41a   : > { %v2916_v55 = vpop.permute.xlu0 %2915  ;;  %v2881_v56 = vpop.permute.xlu1 %2880 }
 0x41b   : > { %2918 = vst.msk [vmem:[%s3826_s28 + $0x4] sm:$0xf] %vm2878_vm0, %v2916_v55 }
 0x41c   : > { %2884 = vst.msk [vmem:[%s3826_s28] sm:$0xf] %vm2883_vm14, %v2881_v56  ;;  %2927 = vst.msk [vmem:[%s3826_s28 + $0x4] sm:$0xf] %vm2883_vm14, %v2925_v57 }
 0x41d   : > { %2894 = vst.msk [vmem:[%s3826_s28] sm:$0xf] %vm2893_vm3, %v2891_v58 }
 0x41e   : > { %v2929_v59 = vpop.permute.xlu0 %2928 }
 0x41f   : > { %2931 = vst.msk [vmem:[%s3826_s28 + $0x4] sm:$0xf] %vm2893_vm3, %v2929_v59 }
 0x420   : > { %3305 = shalt.err (!%p3302_p3)
}
 0x421   : > { %s3306_s24 = scalar_lea.hbm %s3860_s19, 128  ;;  %s3310_s9 = scalar_lea.hbm %s3908_s3, 256 }
 0x422   : > { %p3307_p4 = scmp.ne.s32.totalorder %s3860_s19, %s3306_s24  ;;  %p3311_p9 = scmp.lt.u32.totalorder %s3860_s19, %s3908_s3 }
 0x423   : > { %p3312_p10 = scmp.lt.u32.totalorder %s3310_s9, %s3306_s24  ;;  %p3314_p12 = scmp.lt.u32.totalorder %s3306_s24, %s3860_s19 }
 0x424   : > { %p3308_p7 = pnand %p3307_p4, %p3450_p5 }
 0x425   : > { %p3313_p11 = por %p3312_p10, %p3311_p9 }
 0x426   : > { %p3309_p8 = pneg %p3308_p7 }
 0x427   : > { %p3315_p13 = por %p3314_p12, %p3313_p11 }
 0x429   : > { %p3316_p0 = pnand %p3315_p13, %p3309_p8 }
 0x42b   : > { %3319 = shalt.err (!%p3316_p0)
}
 0x42c   : > { %3210 = dma.vmem_to_hbm [thread:$0]  (%p3450_p5), %s3862_s25, 128, %s3860_s19, %s2933_s16  }
 0x42d PF: > { %p3216_p1 = scmp.ge.s32.totalorder %s3354_s15, 2  ;;  %s2959_s20 = sand.u32 1, %s3342_s12  }
 0x42e   : > { %s2960_s10 = scalar_lea.sflag [#allocation5], %s2959_s20 }
 0x42f   : > { %p3213_p2 = pnand %p3216_p1, %p3454_p6 }
 0x431   : > { %3337 = dma.done.wait (!%p3213_p2), %s2960_s10, 128  }
 0x432   : > { %3339 = vsyncadd (!%p3213_p2), %s2960_s10, 4294967168  ;;  %p13_p3 = scmp.ge.s32.totalorder %s3437_s18, 4   ;;  %s3911_s12 = smov %s3346_s13 }
 0x433   : > { %s3912_s13 = smov %s3350_s14  ;;  %s3913_s14 = smov %s3448_s21 }
 0x434   : > { %s3914_s15 = smov %s3437_s18  ;;  %15 = sbr.rel (!%p13_p3) target bundleno = 3 (0x3), region = 75 }
 0x43b   :  { %2965 = vsyncpa [#allocation5], 1 }
 0x43c   :  { %2967 = vsyncpa [#allocation5 + $0x1], 1 }

</bundles_post_ra>
